<compile_context>
chip_gen: v5e
topology: v5e:2x2
jax: 0.10.0
libtpu: 0.0.40
codegen_flags: <defaults>
</compile_context>

<pallas_src>
import jax
import jax.numpy as jnp
from jax import lax
from jax.experimental import pallas as pl
from jax.experimental.pallas import tpu as pltpu


# ----------------------------- model configuration -----------------------------
SEQ = 8          # sequence length S
INPUT_DIM = 64   # LSTM input_dim
HIDDEN = 32      # LSTM hidden_dim  -> bidirectional output = 2*HIDDEN = 64
OUT_IN = 832     # hardcoded in the module: Linear(832, 64)
OUT_DIM = 64
ADD_DIM = OUT_IN - 3 * HIDDEN   # additional_tensor feature dim = 832 - 96 = 736


# --------------------------------- Pallas kernel --------------------------------
def _bilstm_attn_kernel(
    # inputs
    xd_ref,         # (S, 2*Din)  [x | reverse(x)]
    wih_ref,        # (2*Din, 8H) block-structured fused input weights (g-cols x2)
    b_ih_ref,       # (1, 8H)     fused biases (b_ih + b_hh per direction, g-cols x2)
    whh_ref,        # (2H, 8H)    block-diagonal packed recurrence weights (g-cols x2)
    w_att_ref,      # (1, 2H)     attention weight row
    w_lin_out_ref,  # (2H, 64)    = w_lin @ w_out[0:H]
    w_out2_ref,     # (2H, 64)    W_out rows for attentive representation segment
    b_out_ref,      # (1, 64)     = b_out + b_lin @ w_out[0:H]
    w_out3_hbm,     # (Dadd, 64)  W_out rows for additional_tensor segment (HBM)
    add_hbm,        # (S, Dadd)   additional_tensor (HBM)
    # output
    out_ref,        # (S, 64)
    # scratch
    lo_ref,         # VMEM (S, 2H)    bidirectional LSTM output
    w_out3_vmem,    # VMEM (Dadd, 64)
    add_vmem,       # VMEM (S, Dadd)
    dma_sems,       # DMA semaphores (2,)
):
    S = xd_ref.shape[0]
    H = HIDDEN

    # Kick off the output-path DMAs immediately; they complete behind the serial
    # recurrence and are only waited on right before the epilogue matmuls.
    w3_cp = pltpu.make_async_copy(w_out3_hbm, w_out3_vmem, dma_sems.at[0])
    add_cp = pltpu.make_async_copy(add_hbm, add_vmem, dma_sems.at[1])
    w3_cp.start()
    add_cp.start()

    # Fused input-gate precompute for both directions in ONE matmul.  Row t of xg
    # carries forward-step-t gate inputs in the fwd gate columns and backward-step-
    # (S-1-t) gate inputs in the bwd gate columns, because x_dual = [x | reverse(x)]
    # and wih_ref is block-structured over the two row halves.
    xg = (jnp.dot(xd_ref[...], wih_ref[...], preferred_element_type=jnp.float32)
          + b_ih_ref[...])                                   # (S, 8H)

    whh = whh_ref[...]
    h = jnp.zeros((1, 2 * H), jnp.float32)   # [h_fwd | h_bwd]
    c = jnp.zeros((1, 2 * H), jnp.float32)   # [c_fwd | c_bwd]

    # Fully unrolled fused recurrence: fused step t runs forward step t and
    # backward step S-1-t with a single (1,2H)@(2H,8H) MXU matmul.
    for t in range(S):
        g = xg[t:t + 1, :] + jnp.dot(h, whh, preferred_element_type=jnp.float32)
        # Single sigmoid pass per step; cell-gate columns were pre-scaled by 2 on
        # the host, so tanh(g_orig) = 2*sigmoid(2*g_orig) - 1 is one VPU fma.
        sig = jax.nn.sigmoid(g)              # (1, 8H), one EUP pass
        i_g = sig[:, 0 * 2 * H:1 * 2 * H]    # [i_f | i_b]
        f_g = sig[:, 1 * 2 * H:2 * 2 * H]    # [f_f | f_b]
        g_g = 2.0 * sig[:, 2 * 2 * H:3 * 2 * H] - 1.0   # [g_f | g_b] (tanh)
        o_g = sig[:, 3 * 2 * H:4 * 2 * H]    # [o_f | o_b]
        c = f_g * c + i_g * g_g
        h = o_g * jnp.tanh(c)                # 64-lane tanh only
        # Scatter fwd h to sequence row t and bwd h to sequence row S-1-t; these
        # small stores hide under the next step's MXU/EUP latency.
        lo_ref[t:t + 1, 0:H] = h[:, 0:H]
        lo_ref[S - 1 - t:S - t, H:2 * H] = h[:, H:2 * H]

    lo = lo_ref[...]                                         # (S, 2H)

    # attention = Linear(2H, 1); softmax over the sequence axis.  Implemented as a
    # VPU multiply + lane reduce (no N=1 MXU pass).  The attention bias is omitted:
    # softmax over dim=0 is shift-invariant, so a constant added to every score has
    # no effect on the attention weights.
    scores = jnp.sum(lo * w_att_ref[...], axis=-1, keepdims=True)   # (S, 1)
    att_w = jax.nn.softmax(scores, axis=0)                          # (S, 1)
    attn = jnp.sum(att_w * lo, axis=0, keepdims=True)               # (1, 2H)

    # Output-path operands must be in VMEM now.
    w3_cp.wait()
    add_cp.wait()

    # output_layer(concat([linear_layer(lo), attn.expand(S,-1), additional], dim=1))
    # with linear_layer pre-composed into w_lin_out / b_out on the host.
    out = (jnp.dot(lo, w_lin_out_ref[...], preferred_element_type=jnp.float32)
           + jnp.dot(attn, w_out2_ref[...], preferred_element_type=jnp.float32)   # bcast over S
           + jnp.dot(add_vmem[...], w_out3_vmem[...], preferred_element_type=jnp.float32)
           + b_out_ref[...])
    out_ref[...] = out.astype(out_ref.dtype)


# ------------------------------- host-side packing -------------------------------
def _interleave_gate_cols(wf, wb, H):
    """Interleave fwd/bwd gate column blocks: [i_f,i_b,f_f,f_b,g_f,g_b,o_f,o_b]."""
    blocks = []
    for k in range(4):
        blocks.append(wf[..., k * H:(k + 1) * H])
        blocks.append(wb[..., k * H:(k + 1) * H])
    return jnp.concatenate(blocks, axis=-1)


def _block_pack(wf, wb, H):
    """Pack fwd/bwd weights block-structured over the row halves with interleaved
    gate columns: rows 0:R drive fwd gate columns, rows R:2R drive bwd columns."""
    R = wf.shape[0]
    zero = jnp.zeros((R, H), jnp.float32)
    blocks = []
    for k in range(4):
        blocks.append(jnp.concatenate([wf[:, k * H:(k + 1) * H], zero], axis=0))
        blocks.append(jnp.concatenate([zero, wb[:, k * H:(k + 1) * H]], axis=0))
    return jnp.concatenate(blocks, axis=1)   # (2R, 8H)


def bilstm_attention_img(x, additional_tensor, params):
    """Pallas forward pass. x: (S, INPUT_DIM), additional_tensor: (S, ADD_DIM)."""
    S = x.shape[0]
    H = HIDDEN

    # Fused, block-structured input weights (2*Din, 8H) and biases (1, 8H).
    wih_dual = _block_pack(params["wih_f"], params["wih_b"], H)
    b_cat = _interleave_gate_cols(params["b_f"][None, :], params["b_b"][None, :], H)

    # Block-diagonal packed recurrence weights: rows 0:H carry h_fwd -> fwd gate
    # columns, rows H:2H carry h_bwd -> bwd gate columns, zeros elsewhere.
    whh_pack = _block_pack(params["whh_f"], params["whh_b"], H)       # (2H, 8H)

    # Pre-scale the cell-gate (g) columns by 2 so the kernel recovers tanh from the
    # single sigmoid pass: tanh(z) = 2*sigmoid(2z) - 1.
    scale = jnp.ones((8 * H,), jnp.float32).at[4 * H:6 * H].set(2.0)
    wih_dual = wih_dual * scale
    whh_pack = whh_pack * scale
    b_cat = b_cat * scale

    w_out = params["w_out"]                    # (832, 64)
    w_out1 = w_out[0:H]                        # rows multiplying linear_layer output
    w_out2 = w_out[H:3 * H]                    # rows multiplying attentive representation
    w_out3 = w_out[3 * H:]                     # rows multiplying additional_tensor

    # Fold linear_layer into the output layer (no nonlinearity in between).
    w_lin_out = params["w_lin"] @ w_out1                             # (2H, 64)
    b_out_tot = (params["b_out"] + params["b_lin"] @ w_out1).reshape(1, -1)
    w_att_row = params["w_att"].reshape(1, 2 * H)                    # (1, 2H)

    # Host-side sequence reverse so the kernel never reverses sublanes.
    x_dual = jnp.concatenate([x, x[::-1]], axis=1)                   # (S, 2*Din)

    inputs = (x_dual, wih_dual, b_cat, whh_pack, w_att_row,
              w_lin_out, w_out2, b_out_tot, w_out3, additional_tensor)

    vmem = pl.BlockSpec(memory_space=pltpu.MemorySpace.VMEM)
    hbm = pl.BlockSpec(memory_space=pl.ANY)   # kernel DMAs these itself
    return pl.pallas_call(
        _bilstm_attn_kernel,
        out_shape=jax.ShapeDtypeStruct((S, OUT_DIM), jnp.float32),
        in_specs=[vmem] * 8 + [hbm, hbm],
        out_specs=vmem,
        scratch_shapes=[
            pltpu.VMEM((S, 2 * H), jnp.float32),        # lo (bidirectional LSTM out)
            pltpu.VMEM((ADD_DIM, OUT_DIM), jnp.float32),  # w_out3 landing buffer
            pltpu.VMEM((S, ADD_DIM), jnp.float32),        # additional_tensor buffer
            pltpu.SemaphoreType.DMA((2,)),
        ],
    )(*inputs)


# ------------------------------ pure-JAX reference ------------------------------
def reference(x, additional_tensor, params):
    S = x.shape[0]
    H = HIDDEN

    def run_lstm(xs, wih, whh, b):
        def step(carry, x_t):
            h, c = carry
            g = x_t @ wih + h @ whh + b
            i_g = jax.nn.sigmoid(g[0 * H:1 * H])
            f_g = jax.nn.sigmoid(g[1 * H:2 * H])
            g_g = jnp.tanh(g[2 * H:3 * H])
            o_g = jax.nn.sigmoid(g[3 * H:4 * H])
            c = f_g * c + i_g * g_g
            h = o_g * jnp.tanh(c)
            return (h, c), h
        _, hs = lax.scan(step, (jnp.zeros(H), jnp.zeros(H)), xs)
        return hs

    hf = run_lstm(x, params["wih_f"], params["whh_f"], params["b_f"])
    hb = run_lstm(x[::-1], params["wih_b"], params["whh_b"], params["b_b"])[::-1]
    lo = jnp.concatenate([hf, hb], axis=1)                           # (S, 2H)

    scores = lo @ params["w_att"] + params["b_att"]                  # (S, 1)
    att_w = jax.nn.softmax(scores, axis=0)
    attn = jnp.sum(att_w * lo, axis=0)                               # (2H,)

    lin = lo @ params["w_lin"] + params["b_lin"]                     # (S, H)
    feat = jnp.concatenate(
        [lin, jnp.broadcast_to(attn, (S, 2 * H)), additional_tensor], axis=1)
    return feat @ params["w_out"] + params["b_out"]


# ----------------------------------- params -------------------------------------
def init_params(key):
    H, Din = HIDDEN, INPUT_DIM
    bound = 1.0 / jnp.sqrt(H)
    keys = jax.random.split(key, 16)
    u = lambda k, shape: jax.random.uniform(k, shape, jnp.float32, -bound, bound)
    return {
        "wih_f": u(keys[0], (Din, 4 * H)),
        "whh_f": u(keys[1], (H, 4 * H)),
        "b_f":   u(keys[2], (4 * H,)),          # b_ih + b_hh folded together
        "wih_b": u(keys[3], (Din, 4 * H)),
        "whh_b": u(keys[4], (H, 4 * H)),
        "b_b":   u(keys[5], (4 * H,)),
        "w_att": u(keys[6], (2 * H, 1)),
        "b_att": u(keys[7], (1,)),
        "w_lin": u(keys[8], (2 * H, H)),
        "b_lin": u(keys[9], (H,)),
        "w_out": jax.random.uniform(keys[10], (OUT_IN, OUT_DIM), jnp.float32,
                                    -1.0 / jnp.sqrt(OUT_IN), 1.0 / jnp.sqrt(OUT_IN)),
        "b_out": jax.random.uniform(keys[11], (OUT_DIM,), jnp.float32,
                                    -1.0 / jnp.sqrt(OUT_IN), 1.0 / jnp.sqrt(OUT_IN)),
    }


if __name__ == "__main__":
    key = jax.random.PRNGKey(0)
    k_x, k_add, k_p = jax.random.split(key, 3)

    x = jax.random.normal(k_x, (SEQ, INPUT_DIM), jnp.float32)
    additional_tensor = jax.random.normal(k_add, (SEQ, ADD_DIM), jnp.float32)
    params = init_params(k_p)

    out = bilstm_attention_img(x, additional_tensor, params)
    out = jax.block_until_ready(out)

    ref = jax.block_until_ready(reference(x, additional_tensor, params))
    assert out.shape == (SEQ, OUT_DIM), out.shape
    assert jnp.allclose(out, ref, atol=1e-3, rtol=1e-3), float(jnp.max(jnp.abs(out - ref)))

    print("KERNEL_OK")
</pallas_src>

<mosaic_0001>
module attributes {stable_mosaic.version = 11 : i64} {
  func.func @_bilstm_attn_kernel(%arg0: memref<8x128xf32, #tpu.memory_space<vmem>>, %arg1: memref<128x256xf32, #tpu.memory_space<vmem>>, %arg2: memref<1x256xf32, #tpu.memory_space<vmem>>, %arg3: memref<64x256xf32, #tpu.memory_space<vmem>>, %arg4: memref<1x64xf32, #tpu.memory_space<vmem>>, %arg5: memref<64x64xf32, #tpu.memory_space<vmem>>, %arg6: memref<64x64xf32, #tpu.memory_space<vmem>>, %arg7: memref<1x64xf32, #tpu.memory_space<vmem>>, %arg8: memref<736x64xf32, #tpu.memory_space<any>>, %arg9: memref<8x736xf32, #tpu.memory_space<any>>, %arg10: memref<8x64xf32, #tpu.memory_space<vmem>>, %arg11: memref<8x64xf32, #tpu.memory_space<vmem>>, %arg12: memref<736x64xf32, #tpu.memory_space<vmem>>, %arg13: memref<8x736xf32, #tpu.memory_space<vmem>>, %arg14: memref<2x!tpu.dma_semaphore, #tpu.memory_space<semaphore_mem>>) attributes {dimension_semantics = [], scalar_prefetch = 0 : i64, scratch_operands = 4 : i64, tpu.core_type = #tpu.core_type<tc>} {
    %c0_i32 = arith.constant 0 : i32
    %0 = tpu.memref_slice %arg14[%c0_i32] : memref<2x!tpu.dma_semaphore, #tpu.memory_space<semaphore_mem>> -> memref<1x!tpu.dma_semaphore, #tpu.memory_space<semaphore_mem>>
    %1 = tpu.memref_squeeze %0 : memref<1x!tpu.dma_semaphore, #tpu.memory_space<semaphore_mem>> -> memref<!tpu.dma_semaphore, #tpu.memory_space<semaphore_mem>>
    tpu.enqueue_dma source(%arg8 : memref<736x64xf32, #tpu.memory_space<any>>) target(%arg12 : memref<736x64xf32, #tpu.memory_space<vmem>>) target_semaphore(%1 : memref<!tpu.dma_semaphore, #tpu.memory_space<semaphore_mem>>)
    %c1_i32 = arith.constant 1 : i32
    %2 = tpu.memref_slice %arg14[%c1_i32] : memref<2x!tpu.dma_semaphore, #tpu.memory_space<semaphore_mem>> -> memref<1x!tpu.dma_semaphore, #tpu.memory_space<semaphore_mem>>
    %3 = tpu.memref_squeeze %2 : memref<1x!tpu.dma_semaphore, #tpu.memory_space<semaphore_mem>> -> memref<!tpu.dma_semaphore, #tpu.memory_space<semaphore_mem>>
    tpu.enqueue_dma source(%arg9 : memref<8x736xf32, #tpu.memory_space<any>>) target(%arg13 : memref<8x736xf32, #tpu.memory_space<vmem>>) target_semaphore(%3 : memref<!tpu.dma_semaphore, #tpu.memory_space<semaphore_mem>>)
    %c0 = arith.constant 0 : index
    %c0_0 = arith.constant 0 : index
    %4 = vector.load %arg0[%c0, %c0_0] : memref<8x128xf32, #tpu.memory_space<vmem>>, vector<8x128xf32>
    %c0_1 = arith.constant 0 : index
    %c0_2 = arith.constant 0 : index
    %5 = vector.load %arg1[%c0_1, %c0_2] : memref<128x256xf32, #tpu.memory_space<vmem>>, vector<128x256xf32>
    %cst = arith.constant dense<0.000000e+00> : vector<8x256xf32>
    %6 = tpu.matmul %4, %5, %cst {dimension_numbers = #tpu.dot_dimension_numbers<[1], [0], [0], [1], [0, 0, 1, 1], [], []>} : vector<8x128xf32>, vector<128x256xf32>, vector<8x256xf32> -> vector<8x256xf32>
    %c0_3 = arith.constant 0 : index
    %c0_4 = arith.constant 0 : index
    %7 = vector.load %arg2[%c0_3, %c0_4] : memref<1x256xf32, #tpu.memory_space<vmem>>, vector<1x256xf32>
    %8 = vector.broadcast %7 : vector<1x256xf32> to vector<8x256xf32>
    %9 = arith.addf %6, %8 : vector<8x256xf32>
    %c0_5 = arith.constant 0 : index
    %c0_6 = arith.constant 0 : index
    %10 = vector.load %arg3[%c0_5, %c0_6] : memref<64x256xf32, #tpu.memory_space<vmem>>, vector<64x256xf32>
    %cst_7 = arith.constant 0.000000e+00 : f32
    %11 = vector.broadcast %cst_7 : f32 to vector<1x64xf32>
    %cst_8 = arith.constant 0.000000e+00 : f32
    %12 = vector.broadcast %cst_8 : f32 to vector<1x64xf32>
    %13 = vector.extract_strided_slice %9 {offsets = [0, 0], sizes = [1, 256], strides = [1, 1]} : vector<8x256xf32> to vector<1x256xf32>
    %cst_9 = arith.constant dense<0.000000e+00> : vector<1x256xf32>
    %14 = tpu.matmul %11, %10, %cst_9 {dimension_numbers = #tpu.dot_dimension_numbers<[1], [0], [0], [1], [0, 0, 1, 1], [], []>} : vector<1x64xf32>, vector<64x256xf32>, vector<1x256xf32> -> vector<1x256xf32>
    %15 = arith.addf %13, %14 : vector<1x256xf32>
    %16 = arith.negf %15 : vector<1x256xf32>
    %17 = math.exp %16 : vector<1x256xf32>
    %cst_10 = arith.constant 1.000000e+00 : f32
    %18 = vector.broadcast %cst_10 : f32 to vector<1x256xf32>
    %19 = arith.addf %18, %17 : vector<1x256xf32>
    %20 = arith.divf %18, %19 : vector<1x256xf32>
    %21 = vector.extract_strided_slice %20 {offsets = [0, 0], sizes = [1, 64], strides = [1, 1]} : vector<1x256xf32> to vector<1x64xf32>
    %22 = vector.extract_strided_slice %20 {offsets = [0, 64], sizes = [1, 64], strides = [1, 1]} : vector<1x256xf32> to vector<1x64xf32>
    %23 = vector.extract_strided_slice %20 {offsets = [0, 128], sizes = [1, 64], strides = [1, 1]} : vector<1x256xf32> to vector<1x64xf32>
    %cst_11 = arith.constant 2.000000e+00 : f32
    %24 = vector.broadcast %cst_11 : f32 to vector<1x64xf32>
    %25 = arith.mulf %24, %23 : vector<1x64xf32>
    %cst_12 = arith.constant 1.000000e+00 : f32
    %26 = vector.broadcast %cst_12 : f32 to vector<1x64xf32>
    %27 = arith.subf %25, %26 : vector<1x64xf32>
    %28 = vector.extract_strided_slice %20 {offsets = [0, 192], sizes = [1, 64], strides = [1, 1]} : vector<1x256xf32> to vector<1x64xf32>
    %29 = arith.mulf %22, %12 : vector<1x64xf32>
    %30 = arith.mulf %21, %27 : vector<1x64xf32>
    %31 = arith.addf %29, %30 : vector<1x64xf32>
    %32 = math.tanh %31 : vector<1x64xf32>
    %33 = arith.mulf %28, %32 : vector<1x64xf32>
    %34 = vector.extract_strided_slice %33 {offsets = [0, 0], sizes = [1, 32], strides = [1, 1]} : vector<1x64xf32> to vector<1x32xf32>
    %c0_13 = arith.constant 0 : index
    %c0_14 = arith.constant 0 : index
    %35 = vector.load %arg11[%c0_13, %c0_14] : memref<8x64xf32, #tpu.memory_space<vmem>>, vector<1x32xf32>
    tpu.vector_store %arg11[%c0_13, %c0_14], %34 {strides = array<i32>} : memref<8x64xf32, #tpu.memory_space<vmem>>, vector<1x32xf32>,
    %36 = vector.extract_strided_slice %33 {offsets = [0, 32], sizes = [1, 32], strides = [1, 1]} : vector<1x64xf32> to vector<1x32xf32>
    %c7 = arith.constant 7 : index
    %c32 = arith.constant 32 : index
    %37 = vector.load %arg11[%c7, %c32] : memref<8x64xf32, #tpu.memory_space<vmem>>, vector<1x32xf32>
    tpu.vector_store %arg11[%c7, %c32], %36 {strides = array<i32>} : memref<8x64xf32, #tpu.memory_space<vmem>>, vector<1x32xf32>,
    %38 = vector.extract_strided_slice %9 {offsets = [1, 0], sizes = [1, 256], strides = [1, 1]} : vector<8x256xf32> to vector<1x256xf32>
    %cst_15 = arith.constant dense<0.000000e+00> : vector<1x256xf32>
    %39 = tpu.matmul %33, %10, %cst_15 {dimension_numbers = #tpu.dot_dimension_numbers<[1], [0], [0], [1], [0, 0, 1, 1], [], []>} : vector<1x64xf32>, vector<64x256xf32>, vector<1x256xf32> -> vector<1x256xf32>
    %40 = arith.addf %38, %39 : vector<1x256xf32>
    %41 = arith.negf %40 : vector<1x256xf32>
    %42 = math.exp %41 : vector<1x256xf32>
    %cst_16 = arith.constant 1.000000e+00 : f32
    %43 = vector.broadcast %cst_16 : f32 to vector<1x256xf32>
    %44 = arith.addf %43, %42 : vector<1x256xf32>
    %45 = arith.divf %43, %44 : vector<1x256xf32>
    %46 = vector.extract_strided_slice %45 {offsets = [0, 0], sizes = [1, 64], strides = [1, 1]} : vector<1x256xf32> to vector<1x64xf32>
    %47 = vector.extract_strided_slice %45 {offsets = [0, 64], sizes = [1, 64], strides = [1, 1]} : vector<1x256xf32> to vector<1x64xf32>
    %48 = vector.extract_strided_slice %45 {offsets = [0, 128], sizes = [1, 64], strides = [1, 1]} : vector<1x256xf32> to vector<1x64xf32>
    %cst_17 = arith.constant 2.000000e+00 : f32
    %49 = vector.broadcast %cst_17 : f32 to vector<1x64xf32>
    %50 = arith.mulf %49, %48 : vector<1x64xf32>
    %cst_18 = arith.constant 1.000000e+00 : f32
    %51 = vector.broadcast %cst_18 : f32 to vector<1x64xf32>
    %52 = arith.subf %50, %51 : vector<1x64xf32>
    %53 = vector.extract_strided_slice %45 {offsets = [0, 192], sizes = [1, 64], strides = [1, 1]} : vector<1x256xf32> to vector<1x64xf32>
    %54 = arith.mulf %47, %31 : vector<1x64xf32>
    %55 = arith.mulf %46, %52 : vector<1x64xf32>
    %56 = arith.addf %54, %55 : vector<1x64xf32>
    %57 = math.tanh %56 : vector<1x64xf32>
    %58 = arith.mulf %53, %57 : vector<1x64xf32>
    %59 = vector.extract_strided_slice %58 {offsets = [0, 0], sizes = [1, 32], strides = [1, 1]} : vector<1x64xf32> to vector<1x32xf32>
    %c1 = arith.constant 1 : index
    %c0_19 = arith.constant 0 : index
    %60 = vector.load %arg11[%c1, %c0_19] : memref<8x64xf32, #tpu.memory_space<vmem>>, vector<1x32xf32>
    tpu.vector_store %arg11[%c1, %c0_19], %59 {strides = array<i32>} : memref<8x64xf32, #tpu.memory_space<vmem>>, vector<1x32xf32>,
    %61 = vector.extract_strided_slice %58 {offsets = [0, 32], sizes = [1, 32], strides = [1, 1]} : vector<1x64xf32> to vector<1x32xf32>
    %c6 = arith.constant 6 : index
    %c32_20 = arith.constant 32 : index
    %62 = vector.load %arg11[%c6, %c32_20] : memref<8x64xf32, #tpu.memory_space<vmem>>, vector<1x32xf32>
    tpu.vector_store %arg11[%c6, %c32_20], %61 {strides = array<i32>} : memref<8x64xf32, #tpu.memory_space<vmem>>, vector<1x32xf32>,
    %63 = vector.extract_strided_slice %9 {offsets = [2, 0], sizes = [1, 256], strides = [1, 1]} : vector<8x256xf32> to vector<1x256xf32>
    %cst_21 = arith.constant dense<0.000000e+00> : vector<1x256xf32>
    %64 = tpu.matmul %58, %10, %cst_21 {dimension_numbers = #tpu.dot_dimension_numbers<[1], [0], [0], [1], [0, 0, 1, 1], [], []>} : vector<1x64xf32>, vector<64x256xf32>, vector<1x256xf32> -> vector<1x256xf32>
    %65 = arith.addf %63, %64 : vector<1x256xf32>
    %66 = arith.negf %65 : vector<1x256xf32>
    %67 = math.exp %66 : vector<1x256xf32>
    %cst_22 = arith.constant 1.000000e+00 : f32
    %68 = vector.broadcast %cst_22 : f32 to vector<1x256xf32>
    %69 = arith.addf %68, %67 : vector<1x256xf32>
    %70 = arith.divf %68, %69 : vector<1x256xf32>
    %71 = vector.extract_strided_slice %70 {offsets = [0, 0], sizes = [1, 64], strides = [1, 1]} : vector<1x256xf32> to vector<1x64xf32>
    %72 = vector.extract_strided_slice %70 {offsets = [0, 64], sizes = [1, 64], strides = [1, 1]} : vector<1x256xf32> to vector<1x64xf32>
    %73 = vector.extract_strided_slice %70 {offsets = [0, 128], sizes = [1, 64], strides = [1, 1]} : vector<1x256xf32> to vector<1x64xf32>
    %cst_23 = arith.constant 2.000000e+00 : f32
    %74 = vector.broadcast %cst_23 : f32 to vector<1x64xf32>
    %75 = arith.mulf %74, %73 : vector<1x64xf32>
    %cst_24 = arith.constant 1.000000e+00 : f32
    %76 = vector.broadcast %cst_24 : f32 to vector<1x64xf32>
    %77 = arith.subf %75, %76 : vector<1x64xf32>
    %78 = vector.extract_strided_slice %70 {offsets = [0, 192], sizes = [1, 64], strides = [1, 1]} : vector<1x256xf32> to vector<1x64xf32>
    %79 = arith.mulf %72, %56 : vector<1x64xf32>
    %80 = arith.mulf %71, %77 : vector<1x64xf32>
    %81 = arith.addf %79, %80 : vector<1x64xf32>
    %82 = math.tanh %81 : vector<1x64xf32>
    %83 = arith.mulf %78, %82 : vector<1x64xf32>
    %84 = vector.extract_strided_slice %83 {offsets = [0, 0], sizes = [1, 32], strides = [1, 1]} : vector<1x64xf32> to vector<1x32xf32>
    %c2 = arith.constant 2 : index
    %c0_25 = arith.constant 0 : index
    %85 = vector.load %arg11[%c2, %c0_25] : memref<8x64xf32, #tpu.memory_space<vmem>>, vector<1x32xf32>
    tpu.vector_store %arg11[%c2, %c0_25], %84 {strides = array<i32>} : memref<8x64xf32, #tpu.memory_space<vmem>>, vector<1x32xf32>,
    %86 = vector.extract_strided_slice %83 {offsets = [0, 32], sizes = [1, 32], strides = [1, 1]} : vector<1x64xf32> to vector<1x32xf32>
    %c5 = arith.constant 5 : index
    %c32_26 = arith.constant 32 : index
    %87 = vector.load %arg11[%c5, %c32_26] : memref<8x64xf32, #tpu.memory_space<vmem>>, vector<1x32xf32>
    tpu.vector_store %arg11[%c5, %c32_26], %86 {strides = array<i32>} : memref<8x64xf32, #tpu.memory_space<vmem>>, vector<1x32xf32>,
    %88 = vector.extract_strided_slice %9 {offsets = [3, 0], sizes = [1, 256], strides = [1, 1]} : vector<8x256xf32> to vector<1x256xf32>
    %cst_27 = arith.constant dense<0.000000e+00> : vector<1x256xf32>
    %89 = tpu.matmul %83, %10, %cst_27 {dimension_numbers = #tpu.dot_dimension_numbers<[1], [0], [0], [1], [0, 0, 1, 1], [], []>} : vector<1x64xf32>, vector<64x256xf32>, vector<1x256xf32> -> vector<1x256xf32>
    %90 = arith.addf %88, %89 : vector<1x256xf32>
    %91 = arith.negf %90 : vector<1x256xf32>
    %92 = math.exp %91 : vector<1x256xf32>
    %cst_28 = arith.constant 1.000000e+00 : f32
    %93 = vector.broadcast %cst_28 : f32 to vector<1x256xf32>
    %94 = arith.addf %93, %92 : vector<1x256xf32>
    %95 = arith.divf %93, %94 : vector<1x256xf32>
    %96 = vector.extract_strided_slice %95 {offsets = [0, 0], sizes = [1, 64], strides = [1, 1]} : vector<1x256xf32> to vector<1x64xf32>
    %97 = vector.extract_strided_slice %95 {offsets = [0, 64], sizes = [1, 64], strides = [1, 1]} : vector<1x256xf32> to vector<1x64xf32>
    %98 = vector.extract_strided_slice %95 {offsets = [0, 128], sizes = [1, 64], strides = [1, 1]} : vector<1x256xf32> to vector<1x64xf32>
    %cst_29 = arith.constant 2.000000e+00 : f32
    %99 = vector.broadcast %cst_29 : f32 to vector<1x64xf32>
    %100 = arith.mulf %99, %98 : vector<1x64xf32>
    %cst_30 = arith.constant 1.000000e+00 : f32
    %101 = vector.broadcast %cst_30 : f32 to vector<1x64xf32>
    %102 = arith.subf %100, %101 : vector<1x64xf32>
    %103 = vector.extract_strided_slice %95 {offsets = [0, 192], sizes = [1, 64], strides = [1, 1]} : vector<1x256xf32> to vector<1x64xf32>
    %104 = arith.mulf %97, %81 : vector<1x64xf32>
    %105 = arith.mulf %96, %102 : vector<1x64xf32>
    %106 = arith.addf %104, %105 : vector<1x64xf32>
    %107 = math.tanh %106 : vector<1x64xf32>
    %108 = arith.mulf %103, %107 : vector<1x64xf32>
    %109 = vector.extract_strided_slice %108 {offsets = [0, 0], sizes = [1, 32], strides = [1, 1]} : vector<1x64xf32> to vector<1x32xf32>
    %c3 = arith.constant 3 : index
    %c0_31 = arith.constant 0 : index
    %110 = vector.load %arg11[%c3, %c0_31] : memref<8x64xf32, #tpu.memory_space<vmem>>, vector<1x32xf32>
    tpu.vector_store %arg11[%c3, %c0_31], %109 {strides = array<i32>} : memref<8x64xf32, #tpu.memory_space<vmem>>, vector<1x32xf32>,
    %111 = vector.extract_strided_slice %108 {offsets = [0, 32], sizes = [1, 32], strides = [1, 1]} : vector<1x64xf32> to vector<1x32xf32>
    %c4 = arith.constant 4 : index
    %c32_32 = arith.constant 32 : index
    %112 = vector.load %arg11[%c4, %c32_32] : memref<8x64xf32, #tpu.memory_space<vmem>>, vector<1x32xf32>
    tpu.vector_store %arg11[%c4, %c32_32], %111 {strides = array<i32>} : memref<8x64xf32, #tpu.memory_space<vmem>>, vector<1x32xf32>,
    %113 = vector.extract_strided_slice %9 {offsets = [4, 0], sizes = [1, 256], strides = [1, 1]} : vector<8x256xf32> to vector<1x256xf32>
    %cst_33 = arith.constant dense<0.000000e+00> : vector<1x256xf32>
    %114 = tpu.matmul %108, %10, %cst_33 {dimension_numbers = #tpu.dot_dimension_numbers<[1], [0], [0], [1], [0, 0, 1, 1], [], []>} : vector<1x64xf32>, vector<64x256xf32>, vector<1x256xf32> -> vector<1x256xf32>
    %115 = arith.addf %113, %114 : vector<1x256xf32>
    %116 = arith.negf %115 : vector<1x256xf32>
    %117 = math.exp %116 : vector<1x256xf32>
    %cst_34 = arith.constant 1.000000e+00 : f32
    %118 = vector.broadcast %cst_34 : f32 to vector<1x256xf32>
    %119 = arith.addf %118, %117 : vector<1x256xf32>
    %120 = arith.divf %118, %119 : vector<1x256xf32>
    %121 = vector.extract_strided_slice %120 {offsets = [0, 0], sizes = [1, 64], strides = [1, 1]} : vector<1x256xf32> to vector<1x64xf32>
    %122 = vector.extract_strided_slice %120 {offsets = [0, 64], sizes = [1, 64], strides = [1, 1]} : vector<1x256xf32> to vector<1x64xf32>
    %123 = vector.extract_strided_slice %120 {offsets = [0, 128], sizes = [1, 64], strides = [1, 1]} : vector<1x256xf32> to vector<1x64xf32>
    %cst_35 = arith.constant 2.000000e+00 : f32
    %124 = vector.broadcast %cst_35 : f32 to vector<1x64xf32>
    %125 = arith.mulf %124, %123 : vector<1x64xf32>
    %cst_36 = arith.constant 1.000000e+00 : f32
    %126 = vector.broadcast %cst_36 : f32 to vector<1x64xf32>
    %127 = arith.subf %125, %126 : vector<1x64xf32>
    %128 = vector.extract_strided_slice %120 {offsets = [0, 192], sizes = [1, 64], strides = [1, 1]} : vector<1x256xf32> to vector<1x64xf32>
    %129 = arith.mulf %122, %106 : vector<1x64xf32>
    %130 = arith.mulf %121, %127 : vector<1x64xf32>
    %131 = arith.addf %129, %130 : vector<1x64xf32>
    %132 = math.tanh %131 : vector<1x64xf32>
    %133 = arith.mulf %128, %132 : vector<1x64xf32>
    %134 = vector.extract_strided_slice %133 {offsets = [0, 0], sizes = [1, 32], strides = [1, 1]} : vector<1x64xf32> to vector<1x32xf32>
    %c4_37 = arith.constant 4 : index
    %c0_38 = arith.constant 0 : index
    %135 = vector.load %arg11[%c4_37, %c0_38] : memref<8x64xf32, #tpu.memory_space<vmem>>, vector<1x32xf32>
    tpu.vector_store %arg11[%c4_37, %c0_38], %134 {strides = array<i32>} : memref<8x64xf32, #tpu.memory_space<vmem>>, vector<1x32xf32>,
    %136 = vector.extract_strided_slice %133 {offsets = [0, 32], sizes = [1, 32], strides = [1, 1]} : vector<1x64xf32> to vector<1x32xf32>
    %c3_39 = arith.constant 3 : index
    %c32_40 = arith.constant 32 : index
    %137 = vector.load %arg11[%c3_39, %c32_40] : memref<8x64xf32, #tpu.memory_space<vmem>>, vector<1x32xf32>
    tpu.vector_store %arg11[%c3_39, %c32_40], %136 {strides = array<i32>} : memref<8x64xf32, #tpu.memory_space<vmem>>, vector<1x32xf32>,
    %138 = vector.extract_strided_slice %9 {offsets = [5, 0], sizes = [1, 256], strides = [1, 1]} : vector<8x256xf32> to vector<1x256xf32>
    %cst_41 = arith.constant dense<0.000000e+00> : vector<1x256xf32>
    %139 = tpu.matmul %133, %10, %cst_41 {dimension_numbers = #tpu.dot_dimension_numbers<[1], [0], [0], [1], [0, 0, 1, 1], [], []>} : vector<1x64xf32>, vector<64x256xf32>, vector<1x256xf32> -> vector<1x256xf32>
    %140 = arith.addf %138, %139 : vector<1x256xf32>
    %141 = arith.negf %140 : vector<1x256xf32>
    %142 = math.exp %141 : vector<1x256xf32>
    %cst_42 = arith.constant 1.000000e+00 : f32
    %143 = vector.broadcast %cst_42 : f32 to vector<1x256xf32>
    %144 = arith.addf %143, %142 : vector<1x256xf32>
    %145 = arith.divf %143, %144 : vector<1x256xf32>
    %146 = vector.extract_strided_slice %145 {offsets = [0, 0], sizes = [1, 64], strides = [1, 1]} : vector<1x256xf32> to vector<1x64xf32>
    %147 = vector.extract_strided_slice %145 {offsets = [0, 64], sizes = [1, 64], strides = [1, 1]} : vector<1x256xf32> to vector<1x64xf32>
    %148 = vector.extract_strided_slice %145 {offsets = [0, 128], sizes = [1, 64], strides = [1, 1]} : vector<1x256xf32> to vector<1x64xf32>
    %cst_43 = arith.constant 2.000000e+00 : f32
    %149 = vector.broadcast %cst_43 : f32 to vector<1x64xf32>
    %150 = arith.mulf %149, %148 : vector<1x64xf32>
    %cst_44 = arith.constant 1.000000e+00 : f32
    %151 = vector.broadcast %cst_44 : f32 to vector<1x64xf32>
    %152 = arith.subf %150, %151 : vector<1x64xf32>
    %153 = vector.extract_strided_slice %145 {offsets = [0, 192], sizes = [1, 64], strides = [1, 1]} : vector<1x256xf32> to vector<1x64xf32>
    %154 = arith.mulf %147, %131 : vector<1x64xf32>
    %155 = arith.mulf %146, %152 : vector<1x64xf32>
    %156 = arith.addf %154, %155 : vector<1x64xf32>
    %157 = math.tanh %156 : vector<1x64xf32>
    %158 = arith.mulf %153, %157 : vector<1x64xf32>
    %159 = vector.extract_strided_slice %158 {offsets = [0, 0], sizes = [1, 32], strides = [1, 1]} : vector<1x64xf32> to vector<1x32xf32>
    %c5_45 = arith.constant 5 : index
    %c0_46 = arith.constant 0 : index
    %160 = vector.load %arg11[%c5_45, %c0_46] : memref<8x64xf32, #tpu.memory_space<vmem>>, vector<1x32xf32>
    tpu.vector_store %arg11[%c5_45, %c0_46], %159 {strides = array<i32>} : memref<8x64xf32, #tpu.memory_space<vmem>>, vector<1x32xf32>,
    %161 = vector.extract_strided_slice %158 {offsets = [0, 32], sizes = [1, 32], strides = [1, 1]} : vector<1x64xf32> to vector<1x32xf32>
    %c2_47 = arith.constant 2 : index
    %c32_48 = arith.constant 32 : index
    %162 = vector.load %arg11[%c2_47, %c32_48] : memref<8x64xf32, #tpu.memory_space<vmem>>, vector<1x32xf32>
    tpu.vector_store %arg11[%c2_47, %c32_48], %161 {strides = array<i32>} : memref<8x64xf32, #tpu.memory_space<vmem>>, vector<1x32xf32>,
    %163 = vector.extract_strided_slice %9 {offsets = [6, 0], sizes = [1, 256], strides = [1, 1]} : vector<8x256xf32> to vector<1x256xf32>
    %cst_49 = arith.constant dense<0.000000e+00> : vector<1x256xf32>
    %164 = tpu.matmul %158, %10, %cst_49 {dimension_numbers = #tpu.dot_dimension_numbers<[1], [0], [0], [1], [0, 0, 1, 1], [], []>} : vector<1x64xf32>, vector<64x256xf32>, vector<1x256xf32> -> vector<1x256xf32>
    %165 = arith.addf %163, %164 : vector<1x256xf32>
    %166 = arith.negf %165 : vector<1x256xf32>
    %167 = math.exp %166 : vector<1x256xf32>
    %cst_50 = arith.constant 1.000000e+00 : f32
    %168 = vector.broadcast %cst_50 : f32 to vector<1x256xf32>
    %169 = arith.addf %168, %167 : vector<1x256xf32>
    %170 = arith.divf %168, %169 : vector<1x256xf32>
    %171 = vector.extract_strided_slice %170 {offsets = [0, 0], sizes = [1, 64], strides = [1, 1]} : vector<1x256xf32> to vector<1x64xf32>
    %172 = vector.extract_strided_slice %170 {offsets = [0, 64], sizes = [1, 64], strides = [1, 1]} : vector<1x256xf32> to vector<1x64xf32>
    %173 = vector.extract_strided_slice %170 {offsets = [0, 128], sizes = [1, 64], strides = [1, 1]} : vector<1x256xf32> to vector<1x64xf32>
    %cst_51 = arith.constant 2.000000e+00 : f32
    %174 = vector.broadcast %cst_51 : f32 to vector<1x64xf32>
    %175 = arith.mulf %174, %173 : vector<1x64xf32>
    %cst_52 = arith.constant 1.000000e+00 : f32
    %176 = vector.broadcast %cst_52 : f32 to vector<1x64xf32>
    %177 = arith.subf %175, %176 : vector<1x64xf32>
    %178 = vector.extract_strided_slice %170 {offsets = [0, 192], sizes = [1, 64], strides = [1, 1]} : vector<1x256xf32> to vector<1x64xf32>
    %179 = arith.mulf %172, %156 : vector<1x64xf32>
    %180 = arith.mulf %171, %177 : vector<1x64xf32>
    %181 = arith.addf %179, %180 : vector<1x64xf32>
    %182 = math.tanh %181 : vector<1x64xf32>
    %183 = arith.mulf %178, %182 : vector<1x64xf32>
    %184 = vector.extract_strided_slice %183 {offsets = [0, 0], sizes = [1, 32], strides = [1, 1]} : vector<1x64xf32> to vector<1x32xf32>
    %c6_53 = arith.constant 6 : index
    %c0_54 = arith.constant 0 : index
    %185 = vector.load %arg11[%c6_53, %c0_54] : memref<8x64xf32, #tpu.memory_space<vmem>>, vector<1x32xf32>
    tpu.vector_store %arg11[%c6_53, %c0_54], %184 {strides = array<i32>} : memref<8x64xf32, #tpu.memory_space<vmem>>, vector<1x32xf32>,
    %186 = vector.extract_strided_slice %183 {offsets = [0, 32], sizes = [1, 32], strides = [1, 1]} : vector<1x64xf32> to vector<1x32xf32>
    %c1_55 = arith.constant 1 : index
    %c32_56 = arith.constant 32 : index
    %187 = vector.load %arg11[%c1_55, %c32_56] : memref<8x64xf32, #tpu.memory_space<vmem>>, vector<1x32xf32>
    tpu.vector_store %arg11[%c1_55, %c32_56], %186 {strides = array<i32>} : memref<8x64xf32, #tpu.memory_space<vmem>>, vector<1x32xf32>,
    %188 = vector.extract_strided_slice %9 {offsets = [7, 0], sizes = [1, 256], strides = [1, 1]} : vector<8x256xf32> to vector<1x256xf32>
    %cst_57 = arith.constant dense<0.000000e+00> : vector<1x256xf32>
    %189 = tpu.matmul %183, %10, %cst_57 {dimension_numbers = #tpu.dot_dimension_numbers<[1], [0], [0], [1], [0, 0, 1, 1], [], []>} : vector<1x64xf32>, vector<64x256xf32>, vector<1x256xf32> -> vector<1x256xf32>
    %190 = arith.addf %188, %189 : vector<1x256xf32>
    %191 = arith.negf %190 : vector<1x256xf32>
    %192 = math.exp %191 : vector<1x256xf32>
    %cst_58 = arith.constant 1.000000e+00 : f32
    %193 = vector.broadcast %cst_58 : f32 to vector<1x256xf32>
    %194 = arith.addf %193, %192 : vector<1x256xf32>
    %195 = arith.divf %193, %194 : vector<1x256xf32>
    %196 = vector.extract_strided_slice %195 {offsets = [0, 0], sizes = [1, 64], strides = [1, 1]} : vector<1x256xf32> to vector<1x64xf32>
    %197 = vector.extract_strided_slice %195 {offsets = [0, 64], sizes = [1, 64], strides = [1, 1]} : vector<1x256xf32> to vector<1x64xf32>
    %198 = vector.extract_strided_slice %195 {offsets = [0, 128], sizes = [1, 64], strides = [1, 1]} : vector<1x256xf32> to vector<1x64xf32>
    %cst_59 = arith.constant 2.000000e+00 : f32
    %199 = vector.broadcast %cst_59 : f32 to vector<1x64xf32>
    %200 = arith.mulf %199, %198 : vector<1x64xf32>
    %cst_60 = arith.constant 1.000000e+00 : f32
    %201 = vector.broadcast %cst_60 : f32 to vector<1x64xf32>
    %202 = arith.subf %200, %201 : vector<1x64xf32>
    %203 = vector.extract_strided_slice %195 {offsets = [0, 192], sizes = [1, 64], strides = [1, 1]} : vector<1x256xf32> to vector<1x64xf32>
    %204 = arith.mulf %197, %181 : vector<1x64xf32>
    %205 = arith.mulf %196, %202 : vector<1x64xf32>
    %206 = arith.addf %204, %205 : vector<1x64xf32>
    %207 = math.tanh %206 : vector<1x64xf32>
    %208 = arith.mulf %203, %207 : vector<1x64xf32>
    %209 = vector.extract_strided_slice %208 {offsets = [0, 0], sizes = [1, 32], strides = [1, 1]} : vector<1x64xf32> to vector<1x32xf32>
    %c7_61 = arith.constant 7 : index
    %c0_62 = arith.constant 0 : index
    %210 = vector.load %arg11[%c7_61, %c0_62] : memref<8x64xf32, #tpu.memory_space<vmem>>, vector<1x32xf32>
    tpu.vector_store %arg11[%c7_61, %c0_62], %209 {strides = array<i32>} : memref<8x64xf32, #tpu.memory_space<vmem>>, vector<1x32xf32>,
    %211 = vector.extract_strided_slice %208 {offsets = [0, 32], sizes = [1, 32], strides = [1, 1]} : vector<1x64xf32> to vector<1x32xf32>
    %c0_63 = arith.constant 0 : index
    %c32_64 = arith.constant 32 : index
    %212 = vector.load %arg11[%c0_63, %c32_64] : memref<8x64xf32, #tpu.memory_space<vmem>>, vector<1x32xf32>
    tpu.vector_store %arg11[%c0_63, %c32_64], %211 {strides = array<i32>} : memref<8x64xf32, #tpu.memory_space<vmem>>, vector<1x32xf32>,
    %c0_65 = arith.constant 0 : index
    %c0_66 = arith.constant 0 : index
    %213 = vector.load %arg11[%c0_65, %c0_66] : memref<8x64xf32, #tpu.memory_space<vmem>>, vector<8x64xf32>
    %c0_67 = arith.constant 0 : index
    %c0_68 = arith.constant 0 : index
    %214 = vector.load %arg4[%c0_67, %c0_68] : memref<1x64xf32, #tpu.memory_space<vmem>>, vector<1x64xf32>
    %215 = vector.broadcast %214 : vector<1x64xf32> to vector<8x64xf32>
    %216 = arith.mulf %213, %215 : vector<8x64xf32>
    %cst_69 = arith.constant dense<0.000000e+00> : vector<8xf32>
    %217 = vector.multi_reduction <add>, %216, %cst_69 [1] : vector<8x64xf32> to vector<8xf32>
    %218 = vector.shape_cast %217 : vector<8xf32> to vector<8x1xf32>
    %cst_70 = arith.constant dense<0xFF800000> : vector<1xf32>
    %219 = vector.multi_reduction <maximumf>, %218, %cst_70 [0] : vector<8x1xf32> to vector<1xf32>
    %cst_71 = arith.constant 0xFF800000 : f32
    %220 = vector.broadcast %cst_71 : f32 to vector<1xf32>
    %221 = arith.maximumf %220, %219 : vector<1xf32>
    %222 = vector.shape_cast %221 : vector<1xf32> to vector<1x1xf32>
    %223 = vector.broadcast %222 : vector<1x1xf32> to vector<8x1xf32>
    %224 = arith.subf %218, %223 : vector<8x1xf32>
    %225 = math.exp %224 : vector<8x1xf32>
    %cst_72 = arith.constant dense<0.000000e+00> : vector<1xf32>
    %226 = vector.multi_reduction <add>, %225, %cst_72 [0] : vector<8x1xf32> to vector<1xf32>
    %227 = vector.shape_cast %226 : vector<1xf32> to vector<1x1xf32>
    %228 = vector.broadcast %227 : vector<1x1xf32> to vector<8x1xf32>
    %229 = arith.divf %225, %228 : vector<8x1xf32>
    %230 = vector.broadcast %229 : vector<8x1xf32> to vector<8x64xf32>
    %231 = arith.mulf %230, %213 : vector<8x64xf32>
    %cst_73 = arith.constant dense<0.000000e+00> : vector<64xf32>
    %232 = vector.multi_reduction <add>, %231, %cst_73 [0] : vector<8x64xf32> to vector<64xf32>
    %233 = vector.shape_cast %232 : vector<64xf32> to vector<1x64xf32>
    %c0_i32_74 = arith.constant 0 : i32
    %234 = tpu.memref_slice %arg14[%c0_i32_74] : memref<2x!tpu.dma_semaphore, #tpu.memory_space<semaphore_mem>> -> memref<1x!tpu.dma_semaphore, #tpu.memory_space<semaphore_mem>>
    %235 = tpu.memref_squeeze %234 : memref<1x!tpu.dma_semaphore, #tpu.memory_space<semaphore_mem>> -> memref<!tpu.dma_semaphore, #tpu.memory_space<semaphore_mem>>
    tpu.wait_dma2 semaphore(%235 : memref<!tpu.dma_semaphore, #tpu.memory_space<semaphore_mem>>) src(%arg8 : memref<736x64xf32, #tpu.memory_space<any>>) dst(%arg12 : memref<736x64xf32, #tpu.memory_space<vmem>>)
    %c1_i32_75 = arith.constant 1 : i32
    %236 = tpu.memref_slice %arg14[%c1_i32_75] : memref<2x!tpu.dma_semaphore, #tpu.memory_space<semaphore_mem>> -> memref<1x!tpu.dma_semaphore, #tpu.memory_space<semaphore_mem>>
    %237 = tpu.memref_squeeze %236 : memref<1x!tpu.dma_semaphore, #tpu.memory_space<semaphore_mem>> -> memref<!tpu.dma_semaphore, #tpu.memory_space<semaphore_mem>>
    tpu.wait_dma2 semaphore(%237 : memref<!tpu.dma_semaphore, #tpu.memory_space<semaphore_mem>>) src(%arg9 : memref<8x736xf32, #tpu.memory_space<any>>) dst(%arg13 : memref<8x736xf32, #tpu.memory_space<vmem>>)
    %c0_76 = arith.constant 0 : index
    %c0_77 = arith.constant 0 : index
    %238 = vector.load %arg5[%c0_76, %c0_77] : memref<64x64xf32, #tpu.memory_space<vmem>>, vector<64x64xf32>
    %cst_78 = arith.constant dense<0.000000e+00> : vector<8x64xf32>
    %239 = tpu.matmul %213, %238, %cst_78 {dimension_numbers = #tpu.dot_dimension_numbers<[1], [0], [0], [1], [0, 0, 1, 1], [], []>} : vector<8x64xf32>, vector<64x64xf32>, vector<8x64xf32> -> vector<8x64xf32>
    %c0_79 = arith.constant 0 : index
    %c0_80 = arith.constant 0 : index
    %240 = vector.load %arg6[%c0_79, %c0_80] : memref<64x64xf32, #tpu.memory_space<vmem>>, vector<64x64xf32>
    %cst_81 = arith.constant dense<0.000000e+00> : vector<1x64xf32>
    %241 = tpu.matmul %233, %240, %cst_81 {dimension_numbers = #tpu.dot_dimension_numbers<[1], [0], [0], [1], [0, 0, 1, 1], [], []>} : vector<1x64xf32>, vector<64x64xf32>, vector<1x64xf32> -> vector<1x64xf32>
    %242 = vector.broadcast %241 : vector<1x64xf32> to vector<8x64xf32>
    %243 = arith.addf %239, %242 : vector<8x64xf32>
    %c0_82 = arith.constant 0 : index
    %c0_83 = arith.constant 0 : index
    %244 = vector.load %arg13[%c0_82, %c0_83] : memref<8x736xf32, #tpu.memory_space<vmem>>, vector<8x736xf32>
    %c0_84 = arith.constant 0 : index
    %c0_85 = arith.constant 0 : index
    %245 = vector.load %arg12[%c0_84, %c0_85] : memref<736x64xf32, #tpu.memory_space<vmem>>, vector<736x64xf32>
    %cst_86 = arith.constant dense<0.000000e+00> : vector<8x64xf32>
    %246 = tpu.matmul %244, %245, %cst_86 {dimension_numbers = #tpu.dot_dimension_numbers<[1], [0], [0], [1], [0, 0, 1, 1], [], []>} : vector<8x736xf32>, vector<736x64xf32>, vector<8x64xf32> -> vector<8x64xf32>
    %247 = arith.addf %243, %246 : vector<8x64xf32>
    %c0_87 = arith.constant 0 : index
    %c0_88 = arith.constant 0 : index
    %248 = vector.load %arg7[%c0_87, %c0_88] : memref<1x64xf32, #tpu.memory_space<vmem>>, vector<1x64xf32>
    %249 = vector.broadcast %248 : vector<1x64xf32> to vector<8x64xf32>
    %250 = arith.addf %247, %249 : vector<8x64xf32>
    %c0_89 = arith.constant 0 : index
    %c0_90 = arith.constant 0 : index
    %251 = vector.load %arg10[%c0_89, %c0_90] : memref<8x64xf32, #tpu.memory_space<vmem>>, vector<8x64xf32>
    tpu.vector_store %arg10[%c0_89, %c0_90], %250 {strides = array<i32>} : memref<8x64xf32, #tpu.memory_space<vmem>>, vector<8x64xf32>,
    return
  }
}

</mosaic_0001>

<bundles_post_ra>
// kernel: tpu_custom_call.1
= control target key start
LH: loop header
LB: loop body
LE: loop exit
PB: predicated region body
PF: predicated region fallthrough
CT: control target
= control target key end

     0   :  { %15 = vsyncpa [#allocation7], 0  ;;  %s2914_s0 = inlined_call_operand.vmem [shape: f32[8,128], index: 0, kind: input, shape index: {}]   ;;  %s2915_s1 = inlined_call_operand.vmem [shape: f32[128,256], index: 1, kind: input, shape index: {}]   ;;  %s2916_s2 = inlined_call_operand.vmem [shape: f32[1,256], index: 2, kind: input, shape index: {}]   ;;  %s2917_s3 = inlined_call_operand.vmem [shape: f32[64,256], index: 3, kind: input, shape index: {}]   ;;  %s2918_s4 = inlined_call_operand.vmem [shape: f32[1,64], index: 4, kind: input, shape index: {}]   ;;  %s2919_s5 = inlined_call_operand.vmem [shape: f32[64,64], index: 5, kind: input, shape index: {}]   ;;  %s2920_s6 = inlined_call_operand.vmem [shape: f32[64,64], index: 6, kind: input, shape index: {}]   ;;  %s2921_s7 = inlined_call_operand.vmem [shape: f32[1,64], index: 7, kind: input, shape index: {}]   ;;  %s2922_s8 = inlined_call_operand.vmem [shape: f32[736,64], index: 8, kind: input, shape index: {}]   ;;  %s2923_s9 = inlined_call_operand.vmem [shape: f32[8,736], index: 9, kind: input, shape index: {}]   ;;  %s2924_s10 = inlined_call_operand.hbm [shape: f32[8,64], index: 10, kind: output, shape index: {}]  }
   0x1   :  { %v1853_v0 = vld [vmem:[%s2922_s8] sm:$0xff]  ;;  %v1858_v1 = vld [vmem:[%s2922_s8 + $0x8] sm:$0xff]  ;;  %v1863_v2 = vld [vmem:[%s2922_s8 + $0x10] sm:$0xff] }
   0x2   :  { %2925 = vst [vmem:[#allocation13_spill] sm:$0xff] %v1853_v0  ;;  %v1868_v3 = vld [vmem:[%s2922_s8 + $0x18] sm:$0xff]  ;;  %v1873_v4 = vld [vmem:[%s2922_s8 + $0x20] sm:$0xff]  ;;  %v1878_v5 = vld [vmem:[%s2922_s8 + $0x28] sm:$0xff] }
   0x3   :  { %2926 = vst [vmem:[#allocation14_spill] sm:$0xff] %v1858_v1  ;;  %v1883_v6 = vld [vmem:[%s2922_s8 + $0x30] sm:$0xff]  ;;  %v1888_v7 = vld [vmem:[%s2922_s8 + $0x38] sm:$0xff]  ;;  %v1893_v8 = vld [vmem:[%s2922_s8 + $0x40] sm:$0xff] }
   0x4   :  { %2927 = vst [vmem:[#allocation15_spill] sm:$0xff] %v1863_v2  ;;  %v1898_v9 = vld [vmem:[%s2922_s8 + $0x48] sm:$0xff]  ;;  %v1903_v10 = vld [vmem:[%s2922_s8 + $0x50] sm:$0xff]  ;;  %v1908_v11 = vld [vmem:[%s2922_s8 + $0x58] sm:$0xff] }
   0x5   :  { %2928 = vst [vmem:[#allocation16_spill] sm:$0xff] %v1868_v3  ;;  %v1913_v12 = vld [vmem:[%s2922_s8 + $0x60] sm:$0xff]  ;;  %v1918_v13 = vld [vmem:[%s2922_s8 + $0x68] sm:$0xff]  ;;  %v1923_v14 = vld [vmem:[%s2922_s8 + $0x70] sm:$0xff] }
   0x6   :  { %2929 = vst [vmem:[#allocation17_spill] sm:$0xff] %v1873_v4  ;;  %v1928_v15 = vld [vmem:[%s2922_s8 + $0x78] sm:$0xff]  ;;  %v1933_v16 = vld [vmem:[%s2922_s8 + $0x80] sm:$0xff]  ;;  %v1938_v17 = vld [vmem:[%s2922_s8 + $0x88] sm:$0xff] }
   0x7   :  { %2930 = vst [vmem:[#allocation18_spill] sm:$0xff] %v1933_v16  ;;  %v1943_v18 = vld [vmem:[%s2922_s8 + $0x90] sm:$0xff]  ;;  %v1948_v19 = vld [vmem:[%s2922_s8 + $0x98] sm:$0xff]  ;;  %v1953_v20 = vld [vmem:[%s2922_s8 + $0xa0] sm:$0xff] }
   0x8   :  { %2931 = vst [vmem:[#allocation19_spill] sm:$0xff] %v1938_v17  ;;  %v1958_v21 = vld [vmem:[%s2922_s8 + $0xa8] sm:$0xff]  ;;  %v1963_v22 = vld [vmem:[%s2922_s8 + $0xb0] sm:$0xff]  ;;  %v1968_v23 = vld [vmem:[%s2922_s8 + $0xb8] sm:$0xff] }
   0x9   :  { %2932 = vst [vmem:[#allocation20_spill] sm:$0xff] %v1943_v18  ;;  %v1973_v24 = vld [vmem:[%s2922_s8 + $0xc0] sm:$0xff]  ;;  %v1978_v25 = vld [vmem:[%s2922_s8 + $0xc8] sm:$0xff]  ;;  %v1983_v26 = vld [vmem:[%s2922_s8 + $0xd0] sm:$0xff] }
   0xa   :  { %2933 = vst [vmem:[#allocation21_spill] sm:$0xff] %v1948_v19  ;;  %v1988_v27 = vld [vmem:[%s2922_s8 + $0xd8] sm:$0xff]  ;;  %v1993_v28 = vld [vmem:[%s2922_s8 + $0xe0] sm:$0xff]  ;;  %v1998_v29 = vld [vmem:[%s2922_s8 + $0xe8] sm:$0xff] }
   0xb   :  { %2934 = vst [vmem:[#allocation22_spill] sm:$0xff] %v1953_v20  ;;  %v2003_v30 = vld [vmem:[%s2922_s8 + $0xf0] sm:$0xff]  ;;  %v2008_v31 = vld [vmem:[%s2922_s8 + $0xf8] sm:$0xff]  ;;  %v2013_v32 = vld [vmem:[%s2922_s8 + $0x100] sm:$0xff] }
   0xc   :  { %2935 = vst [vmem:[#allocation23_spill] sm:$0xff] %v1958_v21  ;;  %v2018_v33 = vld [vmem:[%s2922_s8 + $0x108] sm:$0xff]  ;;  %v2023_v34 = vld [vmem:[%s2922_s8 + $0x110] sm:$0xff]  ;;  %v2028_v35 = vld [vmem:[%s2922_s8 + $0x118] sm:$0xff] }
   0xd   :  { %2936 = vst [vmem:[#allocation24_spill] sm:$0xff] %v2013_v32  ;;  %v2033_v36 = vld [vmem:[%s2922_s8 + $0x120] sm:$0xff]  ;;  %v2038_v37 = vld [vmem:[%s2922_s8 + $0x128] sm:$0xff]  ;;  %v2043_v38 = vld [vmem:[%s2922_s8 + $0x130] sm:$0xff] }
   0xe   :  { %2937 = vst [vmem:[#allocation25_spill] sm:$0xff] %v2018_v33  ;;  %v2048_v39 = vld [vmem:[%s2922_s8 + $0x138] sm:$0xff]  ;;  %v2053_v40 = vld [vmem:[%s2922_s8 + $0x140] sm:$0xff]  ;;  %v2058_v41 = vld [vmem:[%s2922_s8 + $0x148] sm:$0xff] }
   0xf   :  { %2938 = vst [vmem:[#allocation26_spill] sm:$0xff] %v2023_v34  ;;  %v2063_v42 = vld [vmem:[%s2922_s8 + $0x150] sm:$0xff]  ;;  %v2068_v43 = vld [vmem:[%s2922_s8 + $0x158] sm:$0xff]  ;;  %v2073_v44 = vld [vmem:[%s2922_s8 + $0x160] sm:$0xff] }
  0x10   :  { %2939 = vst [vmem:[#allocation27_spill] sm:$0xff] %v2028_v35  ;;  %v2078_v45 = vld [vmem:[%s2922_s8 + $0x168] sm:$0xff]  ;;  %v2083_v46 = vld [vmem:[%s2922_s8 + $0x170] sm:$0xff]  ;;  %v2088_v47 = vld [vmem:[%s2922_s8 + $0x178] sm:$0xff] }
  0x11   :  { %2940 = vst [vmem:[#allocation28_spill] sm:$0xff] %v2033_v36  ;;  %v2093_v48 = vld [vmem:[%s2922_s8 + $0x180] sm:$0xff]  ;;  %v2098_v49 = vld [vmem:[%s2922_s8 + $0x188] sm:$0xff]  ;;  %v2103_v50 = vld [vmem:[%s2922_s8 + $0x190] sm:$0xff] }
  0x12   :  { %2941 = vst [vmem:[#allocation29_spill] sm:$0xff] %v2038_v37  ;;  %v2108_v51 = vld [vmem:[%s2922_s8 + $0x198] sm:$0xff]  ;;  %v2113_v52 = vld [vmem:[%s2922_s8 + $0x1a0] sm:$0xff]  ;;  %v2118_v53 = vld [vmem:[%s2922_s8 + $0x1a8] sm:$0xff] }
  0x13   :  { %2942 = vst [vmem:[#allocation30_spill] sm:$0xff] %v2043_v38  ;;  %v2123_v54 = vld [vmem:[%s2922_s8 + $0x1b0] sm:$0xff]  ;;  %v2128_v55 = vld [vmem:[%s2922_s8 + $0x1b8] sm:$0xff]  ;;  %v2133_v56 = vld [vmem:[%s2922_s8 + $0x1c0] sm:$0xff] }
  0x14   :  { %2943 = vst [vmem:[#allocation31_spill] sm:$0xff] %v2048_v39  ;;  %v2138_v57 = vld [vmem:[%s2922_s8 + $0x1c8] sm:$0xff]  ;;  %v2143_v58 = vld [vmem:[%s2922_s8 + $0x1d0] sm:$0xff]  ;;  %v2148_v59 = vld [vmem:[%s2922_s8 + $0x1d8] sm:$0xff] }
  0x15   :  { %2944 = vst [vmem:[#allocation32_spill] sm:$0xff] %v2053_v40  ;;  %v2153_v60 = vld [vmem:[%s2922_s8 + $0x1e0] sm:$0xff]  ;;  %v2158_v61 = vld [vmem:[%s2922_s8 + $0x1e8] sm:$0xff]  ;;  %v2163_v62 = vld [vmem:[%s2922_s8 + $0x1f0] sm:$0xff] }
  0x16   :  { %2945 = vst [vmem:[#allocation33_spill] sm:$0xff] %v2058_v41  ;;  %v2168_v63 = vld [vmem:[%s2922_s8 + $0x1f8] sm:$0xff]  ;;  %v2183_v32 = vld [vmem:[%s2922_s8 + $0x210] sm:$0xff]  ;;  %v2193_v33 = vld [vmem:[%s2922_s8 + $0x220] sm:$0xff] }
  0x17   :  { %2946 = vst [vmem:[#allocation34_spill] sm:$0xff] %v2063_v42  ;;  %v2228_v34 = vld [vmem:[%s2922_s8 + $0x258] sm:$0xff]  ;;  %v2243_v35 = vld [vmem:[%s2922_s8 + $0x270] sm:$0xff] }
  0x18   :  { %2947 = vst [vmem:[#allocation35_spill] sm:$0xff] %v2068_v43  ;;  %v2263_v36 = vld [vmem:[%s2922_s8 + $0x290] sm:$0xff] }
  0x19   :  { %2948 = vst [vmem:[#allocation36_spill] sm:$0xff] %v2073_v44 }
  0x1a   :  { %2949 = vst [vmem:[#allocation37_spill] sm:$0xff] %v2078_v45 }
  0x1b   :  { %2950 = vst [vmem:[#allocation38_spill] sm:$0xff] %v2083_v46 }
  0x1c   :  { %2951 = vst [vmem:[#allocation39_spill] sm:$0xff] %v2088_v47 }
  0x1d   :  { %2952 = vst [vmem:[#allocation40_spill] sm:$0xff] %v2093_v48  ;;  %v2173_v48 = vld [vmem:[%s2922_s8 + $0x200] sm:$0xff] }
  0x1e   :  { %2953 = vst [vmem:[#allocation41_spill] sm:$0xff] %v2098_v49  ;;  %v2178_v49 = vld [vmem:[%s2922_s8 + $0x208] sm:$0xff] }
  0x1f   :  { %2954 = vst [vmem:[#allocation42_spill] sm:$0xff] %v2103_v50  ;;  %v2188_v50 = vld [vmem:[%s2922_s8 + $0x218] sm:$0xff] }
  0x20   :  { %2955 = vst [vmem:[#allocation43_spill] sm:$0xff] %v2108_v51  ;;  %v2223_v51 = vld [vmem:[%s2922_s8 + $0x250] sm:$0xff] }
  0x21   :  { %2956 = vst [vmem:[#allocation44_spill] sm:$0xff] %v2113_v52  ;;  %v2238_v52 = vld [vmem:[%s2922_s8 + $0x268] sm:$0xff] }
  0x22   :  { %2957 = vst [vmem:[#allocation45_spill] sm:$0xff] %v2118_v53  ;;  %v2258_v53 = vld [vmem:[%s2922_s8 + $0x288] sm:$0xff] }
  0x23   :  { %2958 = vst [vmem:[#allocation46_spill] sm:$0xff] %v2123_v54  ;;  %v2273_v54 = vld [vmem:[%s2922_s8 + $0x2a0] sm:$0xff] }
  0x24   :  { %2959 = vst [vmem:[#allocation47_spill] sm:$0xff] %v2128_v55 }
  0x25   :  { %2960 = vst [vmem:[#allocation48_spill] sm:$0xff] %v2133_v56 }
  0x26   :  { %2961 = vst [vmem:[#allocation49_spill] sm:$0xff] %v2138_v57 }
  0x27   :  { %2962 = vst [vmem:[#allocation50_spill] sm:$0xff] %v2143_v58 }
  0x28   :  { %2963 = vst [vmem:[#allocation51_spill] sm:$0xff] %v2148_v59 }
  0x29   :  { %2964 = vst [vmem:[#allocation52_spill] sm:$0xff] %v2153_v60 }
  0x2a   :  { %2965 = vst [vmem:[#allocation53_spill] sm:$0xff] %v2158_v61 }
  0x2b   :  { %2966 = vst [vmem:[#allocation54_spill] sm:$0xff] %v2163_v62 }
  0x2c   :  { %2967 = vst [vmem:[#allocation55_spill] sm:$0xff] %v2168_v63 }
  0x2d   :  { %2968 = vst [vmem:[#allocation56_spill] sm:$0xff] %v2173_v48  ;;  %v2198_v48 = vld [vmem:[%s2922_s8 + $0x228] sm:$0xff] }
  0x2e   :  { %2969 = vst [vmem:[#allocation57_spill] sm:$0xff] %v2178_v49  ;;  %v2203_v49 = vld [vmem:[%s2922_s8 + $0x230] sm:$0xff] }
  0x2f   :  { %2970 = vst [vmem:[#allocation58_spill] sm:$0xff] %v2183_v32  ;;  %v2208_v32 = vld [vmem:[%s2922_s8 + $0x238] sm:$0xff] }
  0x30   :  { %2971 = vst [vmem:[#allocation59_spill] sm:$0xff] %v2188_v50  ;;  %v2213_v50 = vld [vmem:[%s2922_s8 + $0x240] sm:$0xff] }
  0x31   :  { %2972 = vst [vmem:[#allocation60_spill] sm:$0xff] %v2193_v33  ;;  %v2218_v33 = vld [vmem:[%s2922_s8 + $0x248] sm:$0xff] }
  0x32   :  { %2973 = vst [vmem:[#allocation61_spill] sm:$0xff] %v2198_v48  ;;  %v2233_v48 = vld [vmem:[%s2922_s8 + $0x260] sm:$0xff] }
  0x33   :  { %2974 = vst [vmem:[#allocation62_spill] sm:$0xff] %v2203_v49  ;;  %v2248_v49 = vld [vmem:[%s2922_s8 + $0x278] sm:$0xff] }
  0x34   :  { %2975 = vst [vmem:[#allocation63_spill] sm:$0xff] %v2208_v32  ;;  %v2253_v32 = vld [vmem:[%s2922_s8 + $0x280] sm:$0xff] }
  0x35   :  { %2976 = vst [vmem:[#allocation64_spill] sm:$0xff] %v2213_v50  ;;  %v2268_v50 = vld [vmem:[%s2922_s8 + $0x298] sm:$0xff] }
  0x36   :  { %2977 = vst [vmem:[#allocation65_spill] sm:$0xff] %v2218_v33 }
  0x37   :  { %2978 = vst [vmem:[#allocation66_spill] sm:$0xff] %v2223_v51 }
  0x38   :  { %2979 = vst [vmem:[#allocation67_spill] sm:$0xff] %v2228_v34 }
  0x39   :  { %2980 = vst [vmem:[#allocation68_spill] sm:$0xff] %v2233_v48 }
  0x3a   :  { %2981 = vst [vmem:[#allocation69_spill] sm:$0xff] %v2238_v52 }
  0x3b   :  { %2982 = vst [vmem:[#allocation70_spill] sm:$0xff] %v2243_v35 }
  0x3c   :  { %2983 = vst [vmem:[#allocation71_spill] sm:$0xff] %v2248_v49 }
  0x3d   :  { %2984 = vst [vmem:[#allocation72_spill] sm:$0xff] %v2253_v32  ;;  %v2278_v32 = vld [vmem:[%s2922_s8 + $0x2a8] sm:$0xff] }
  0x3e   :  { %2985 = vst [vmem:[#allocation73_spill] sm:$0xff] %v2258_v53  ;;  %v2283_v53 = vld [vmem:[%s2922_s8 + $0x2b0] sm:$0xff] }
  0x3f   :  { %2986 = vst [vmem:[#allocation74_spill] sm:$0xff] %v2263_v36  ;;  %v2288_v36 = vld [vmem:[%s2922_s8 + $0x2b8] sm:$0xff] }
  0x40   :  { %2987 = vst [vmem:[#allocation75_spill] sm:$0xff] %v2268_v50  ;;  %v2293_v50 = vld [vmem:[%s2922_s8 + $0x2c0] sm:$0xff] }
  0x41   :  { %2988 = vst [vmem:[#allocation76_spill] sm:$0xff] %v2273_v54  ;;  %v2298_v54 = vld [vmem:[%s2922_s8 + $0x2c8] sm:$0xff] }
  0x42   :  { %2989 = vst [vmem:[#allocation77_spill] sm:$0xff] %v2278_v32  ;;  %v2303_v32 = vld [vmem:[%s2922_s8 + $0x2d0] sm:$0xff] }
  0x43   :  { %2990 = vst [vmem:[#allocation78_spill] sm:$0xff] %v2283_v53  ;;  %v2308_v53 = vld [vmem:[%s2922_s8 + $0x2d8] sm:$0xff] }
  0x44   :  { %2991 = vst [vmem:[#allocation79_spill] sm:$0xff] %v2288_v36 }
  0x45   :  { %2992 = vst [vmem:[#allocation80_spill] sm:$0xff] %v2293_v50 }
  0x46   :  { %2993 = vst [vmem:[#allocation81_spill] sm:$0xff] %v2298_v54 }
  0x47   :  { %2994 = vst [vmem:[#allocation82_spill] sm:$0xff] %v2303_v32 }
  0x48   :  { %2995 = vst [vmem:[#allocation83_spill] sm:$0xff] %v2308_v53 }
  0x49   :  { %231 = vsyncadd [#allocation5], 11776  ;;  %v2313_v37 = vld [vmem:[%s2923_s9] sm:$0xff]  ;;  %v2318_v33 = vld [vmem:[%s2923_s9 + $0x8] sm:$0xff] }
  0x4a   :  { %2996 = vst [vmem:[#allocation84_spill] sm:$0xff] %v2313_v37  ;;  %v2323_v36 = vld [vmem:[%s2923_s9 + $0x10] sm:$0xff]  ;;  %v2328_v55 = vld [vmem:[%s2923_s9 + $0x18] sm:$0xff]  ;;  %v2333_v38 = vld [vmem:[%s2923_s9 + $0x20] sm:$0xff] }
  0x4b   :  { %2997 = vst [vmem:[#allocation85_spill] sm:$0xff] %v2318_v33  ;;  %v2338_v37 = vld [vmem:[%s2923_s9 + $0x28] sm:$0xff] }
  0x4c   :  { %2998 = vst [vmem:[#allocation86_spill] sm:$0xff] %v2323_v36 }
  0x4d   :  { %2999 = vst [vmem:[#allocation87_spill] sm:$0xff] %v2328_v55 }
  0x4e   :  { %3000 = vst [vmem:[#allocation88_spill] sm:$0xff] %v2333_v38 }
  0x4f   :  { %3001 = vst [vmem:[#allocation89_spill] sm:$0xff] %v2338_v37 }
  0x50   :  { %260 = vsyncadd [#allocation5 + $0x1], 768  ;;  %v292_v36 = vld [vmem:[%s2915_s1 + $0xf0] sm:$0xff]  ;;  %v293_v33 = vld [vmem:[%s2915_s1 + $0xf8] sm:$0xff]  ;;  %vm356_vm8 = vcmask 523264   ;;  %vm455_vm9 = vcmask 253952  }
  0x51   :  { %300 = vmatpush.msra.mxu0 %v292_v36  ;;  %320 = vmatpush.msra.mxu1 %v293_v33  ;;  %v290_v38 = vld [vmem:[%s2915_s1 + $0xe0] sm:$0xff]  ;;  %v291_v55 = vld [vmem:[%s2915_s1 + $0xe8] sm:$0xff]  ;;  %v288_v37 = vld [vmem:[%s2915_s1 + $0xd0] sm:$0xff]  ;;  %vm457_vm10 = vcmask 516352  }
  0x52   :  { %v289_v51 = vld [vmem:[%s2915_s1 + $0xd8] sm:$0xff]  ;;  %v286_v33 = vld [vmem:[%s2915_s1 + $0xc0] sm:$0xff]  ;;  %v287_v36 = vld [vmem:[%s2915_s1 + $0xc8] sm:$0xff] }
  0x53   :  { %301 = vmatpush.msra.mxu0 %v290_v38  ;;  %321 = vmatpush.msra.mxu1 %v291_v55  ;;  %v284_v50 = vld [vmem:[%s2915_s1 + $0xb0] sm:$0xff]  ;;  %v2375_v38 = vld [vmem:[%s2917_s3 + $0x78] sm:$0xff]  ;;  %v282_v34 = vld [vmem:[%s2915_s1 + $0xa0] sm:$0xff] }
  0x54   :  { %v2370_v56 = vld [vmem:[%s2917_s3 + $0x70] sm:$0xff]  ;;  %v285_v55 = vld [vmem:[%s2915_s1 + $0xb8] sm:$0xff]  ;;  %388 = vmatpush.msra.mxu3 %v2375_v38  ;;  %v283_v54 = vld [vmem:[%s2915_s1 + $0xa8] sm:$0xff] }
  0x55   :  { %302 = vmatpush.msra.mxu0 %v288_v37  ;;  %322 = vmatpush.msra.mxu1 %v289_v51  ;;  %v2385_v37 = vld [vmem:[%s2917_s3 + $0x60] sm:$0xff]  ;;  %v2390_v51 = vld [vmem:[%s2917_s3 + $0x68] sm:$0xff]  ;;  %v2395_v39 = vld [vmem:[%s2917_s3 + $0x50] sm:$0xff] }
  0x56   :  { %368 = vmatpush.msra.mxu2 %v2370_v56  ;;  %389 = vmatpush.msra.mxu3 %v2390_v51  ;;  %v2418_v57 = vld [vmem:[%s2917_s3 + $0x48] sm:$0xff]  ;;  %v280_v40 = vld [vmem:[%s2915_s1 + $0x90] sm:$0xff]  ;;  %v281_v48 = vld [vmem:[%s2915_s1 + $0x98] sm:$0xff] }
  0x57   :  { %303 = vmatpush.msra.mxu0 %v286_v33  ;;  %323 = vmatpush.msra.mxu1 %v287_v36  ;;  %v2408_v33 = vld [vmem:[%s2917_s3 + $0x58] sm:$0xff]  ;;  %v2413_v36 = vld [vmem:[%s2917_s3 + $0x40] sm:$0xff]  ;;  %v279_v58 = vld [vmem:[%s2915_s1 + $0x88] sm:$0xff] }
  0x58   :  { %369 = vmatpush.msra.mxu2 %v2385_v37  ;;  %390 = vmatpush.msra.mxu3 %v2408_v33  ;;  %v278_v32 = vld [vmem:[%s2915_s1 + $0x80] sm:$0xff]  ;;  %v276_v41 = vld [vmem:[%s2915_s1 + $0x70] sm:$0xff]  ;;  %v277_v52 = vld [vmem:[%s2915_s1 + $0x78] sm:$0xff] }
  0x59   :  { %304 = vmatpush.msra.mxu0 %v284_v50  ;;  %324 = vmatpush.msra.mxu1 %v285_v55  ;;  %v2431_v50 = vld [vmem:[%s2917_s3 + $0x30] sm:$0xff]  ;;  %v2436_v55 = vld [vmem:[%s2917_s3 + $0x38] sm:$0xff]  ;;  %v274_v53 = vld [vmem:[%s2915_s1 + $0x60] sm:$0xff] }
  0x5a   :  { %370 = vmatpush.msra.mxu2 %v2395_v39  ;;  %391 = vmatpush.msra.mxu3 %v2418_v57  ;;  %v275_v59 = vld [vmem:[%s2915_s1 + $0x68] sm:$0xff]  ;;  %v272_v42 = vld [vmem:[%s2915_s1 + $0x50] sm:$0xff]  ;;  %v273_v35 = vld [vmem:[%s2915_s1 + $0x58] sm:$0xff] }
  0x5b   :  { %305 = vmatpush.msra.mxu0 %v282_v34  ;;  %325 = vmatpush.msra.mxu1 %v283_v54  ;;  %v2449_v34 = vld [vmem:[%s2917_s3 + $0x20] sm:$0xff]  ;;  %v2454_v54 = vld [vmem:[%s2917_s3 + $0x28] sm:$0xff]  ;;  %v268_v16 = vld [vmem:[%s2915_s1 + $0x30] sm:$0xff] }
  0x5c   :  { %371 = vmatpush.msra.mxu2 %v2413_v36  ;;  %392 = vmatpush.msra.mxu3 %v2436_v55  ;;  %v266_v60 = vld [vmem:[%s2915_s1 + $0x20] sm:$0xff] }
  0x5d   :  { %306 = vmatpush.msra.mxu0 %v280_v40  ;;  %326 = vmatpush.msra.mxu1 %v281_v48  ;;  %v2467_v40 = vld [vmem:[%s2917_s3 + $0x10] sm:$0xff]  ;;  %v2472_v48 = vld [vmem:[%s2917_s3 + $0x18] sm:$0xff] }
  0x5e   :  { %372 = vmatpush.msra.mxu2 %v2431_v50  ;;  %393 = vmatpush.msra.mxu3 %v2454_v54 }
  0x5f   :  { %307 = vmatpush.msra.mxu0 %v278_v32  ;;  %327 = vmatpush.msra.mxu1 %v279_v58  ;;  %v2485_v32 = vld [vmem:[%s2917_s3] sm:$0xff]  ;;  %v2490_v58 = vld [vmem:[%s2917_s3 + $0x8] sm:$0xff] }
  0x60   :  { %373 = vmatpush.msra.mxu2 %v2449_v34  ;;  %394 = vmatpush.msra.mxu3 %v2472_v48 }
  0x61   :  { %308 = vmatpush.msra.mxu0 %v276_v41  ;;  %328 = vmatpush.msra.mxu1 %v277_v52  ;;  %v270_v41 = vld [vmem:[%s2915_s1 + $0x40] sm:$0xff]  ;;  %v271_v52 = vld [vmem:[%s2915_s1 + $0x48] sm:$0xff] }
  0x62   :  { %374 = vmatpush.msra.mxu2 %v2467_v40  ;;  %395 = vmatpush.msra.mxu3 %v2490_v58 }
  0x63   :  { %309 = vmatpush.msra.mxu0 %v274_v53  ;;  %329 = vmatpush.msra.mxu1 %v275_v59  ;;  %v269_v53 = vld [vmem:[%s2915_s1 + $0x38] sm:$0xff]  ;;  %v1792_v59 = vmov 0.0  }
  0x64   :  { %375 = vmatpush.msra.mxu2 %v2485_v32  ;;  %396 = vmatmul.f32.vlgmr.msra.gmra.mxu3 %v1792_v59 }
  0x65   :  { %310 = vmatpush.msra.mxu0 %v272_v42  ;;  %330 = vmatpush.msra.mxu1 %v273_v35  ;;  %v267_v35 = vld [vmem:[%s2915_s1 + $0x28] sm:$0xff]  ;;  %v264_v42 = vld [vmem:[%s2915_s1 + $0x10] sm:$0xff] }
  0x66   :  { %376 = vmatmul.f32.vlgmr.msra.gmra.mxu2 %v1792_v59  ;;  %489 = vmatpush.msrb.mxu3 %v2375_v38 }
  0x67   :  { %311 = vmatpush.msra.mxu0 %v270_v41  ;;  %331 = vmatpush.msra.mxu1 %v271_v52  ;;  %v265_v41 = vld [vmem:[%s2915_s1 + $0x18] sm:$0xff]  ;;  %v262_v52 = vld [vmem:[%s2915_s1] sm:$0xff] }
  0x68   :  { %469 = vmatpush.msrb.mxu2 %v2370_v56  ;;  %490 = vmatpush.msrb.mxu3 %v2390_v51 }
  0x69   :  { %312 = vmatpush.msra.mxu0 %v268_v16  ;;  %332 = vmatpush.msra.mxu1 %v269_v53  ;;  %v263_v16 = vld [vmem:[%s2915_s1 + $0x8] sm:$0xff]  ;;  %v261_v53 = vld [vmem:[%s2914_s0] sm:$0xff] }
  0x6a   :  { %470 = vmatpush.msrb.mxu2 %v2385_v37  ;;  %491 = vmatpush.msrb.mxu3 %v2408_v33 }
  0x6b   :  { %313 = vmatpush.msra.mxu0 %v266_v60  ;;  %333 = vmatpush.msra.mxu1 %v267_v35  ;;  %v294_v60 = vld [vmem:[%s2916_s2] sm:$0x3]  ;;  %s1793_s2 = smov 64  }
  0x6c   :  { %471 = vmatpush.msrb.mxu2 %v2395_v39  ;;  %492 = vmatpush.msrb.mxu3 %v2418_v57  ;;  %v296_v59 = vperm.slane %v294_v60, 0  ;;  %v297_v35 = vperm.slane %v294_v60, 1 }
  0x6d   :  { %314 = vmatpush.msra.mxu0 %v264_v42  ;;  %334 = vmatpush.msra.mxu1 %v265_v41 }
  0x6e   :  { %472 = vmatpush.msrb.mxu2 %v2413_v36  ;;  %493 = vmatpush.msrb.mxu3 %v2436_v55 }
  0x6f   :  { %315 = vmatpush.msra.mxu0 %v262_v52  ;;  %335 = vmatpush.msra.mxu1 %v263_v16 }
  0x70   :  { %316 = vmatmul.f32.vlgmr.msra.gmra.mxu0 %v261_v53  ;;  %336 = vmatmul.f32.vlgmr.msra.gmra.mxu1 %v261_v53 }
  0x71   :  { %473 = vmatpush.msrb.mxu2 %v2431_v50  ;;  %582 = vmatpush.msrb.mxu0 %v2370_v56 }
  0x72   :  { %602 = vmatpush.msrb.mxu1 %v2375_v38  ;;  %494 = vmatpush.msrb.mxu3 %v2454_v54 }
  0x73   :  { %474 = vmatpush.msrb.mxu2 %v2449_v34  ;;  %583 = vmatpush.msrb.mxu0 %v2385_v37 }
  0x74   :  { %603 = vmatpush.msrb.mxu1 %v2390_v51  ;;  %495 = vmatpush.msrb.mxu3 %v2472_v48 }
  0x75   :  { %475 = vmatpush.msrb.mxu2 %v2467_v40  ;;  %584 = vmatpush.msrb.mxu0 %v2395_v39 }
  0x76   :  { %604 = vmatpush.msrb.mxu1 %v2408_v33  ;;  %496 = vmatpush.msrb.mxu3 %v2490_v58 }
  0x77   :  { %476 = vmatpush.msrb.mxu2 %v2485_v32  ;;  %585 = vmatpush.msrb.mxu0 %v2413_v36 }
  0x78   :  { %605 = vmatpush.msrb.mxu1 %v2418_v57  ;;  %715 = vmatpush.msra.mxu3 %v2375_v38 }
  0x79   :  { %695 = vmatpush.msra.mxu2 %v2370_v56  ;;  %586 = vmatpush.msrb.mxu0 %v2431_v50 }
  0x7a   :  { %606 = vmatpush.msrb.mxu1 %v2436_v55  ;;  %716 = vmatpush.msra.mxu3 %v2390_v51 }
  0x7b   :  { %696 = vmatpush.msra.mxu2 %v2385_v37  ;;  %587 = vmatpush.msrb.mxu0 %v2449_v34 }
  0x7c   :  { %607 = vmatpush.msrb.mxu1 %v2454_v54  ;;  %717 = vmatpush.msra.mxu3 %v2408_v33 }
  0x7d   :  { %697 = vmatpush.msra.mxu2 %v2395_v39  ;;  %588 = vmatpush.msrb.mxu0 %v2467_v40 }
  0x7e   :  { %608 = vmatpush.msrb.mxu1 %v2472_v48  ;;  %718 = vmatpush.msra.mxu3 %v2418_v57 }
  0x7f   :  { %698 = vmatpush.msra.mxu2 %v2413_v36  ;;  %589 = vmatpush.msrb.mxu0 %v2485_v32 }
  0x80   :  { %609 = vmatpush.msrb.mxu1 %v2490_v58  ;;  %719 = vmatpush.msra.mxu3 %v2436_v55 }
  0x81   :  { %699 = vmatpush.msra.mxu2 %v2431_v50  ;;  %808 = vmatpush.msra.mxu0 %v2370_v56 }
  0x82   :  { %828 = vmatpush.msra.mxu1 %v2375_v38  ;;  %720 = vmatpush.msra.mxu3 %v2454_v54 }
  0x83   :  { %700 = vmatpush.msra.mxu2 %v2449_v34  ;;  %809 = vmatpush.msra.mxu0 %v2385_v37 }
  0x84   :  { %829 = vmatpush.msra.mxu1 %v2390_v51  ;;  %721 = vmatpush.msra.mxu3 %v2472_v48 }
  0x85   :  { %701 = vmatpush.msra.mxu2 %v2467_v40  ;;  %810 = vmatpush.msra.mxu0 %v2395_v39 }
  0x86   :  { %830 = vmatpush.msra.mxu1 %v2408_v33  ;;  %722 = vmatpush.msra.mxu3 %v2490_v58 }
  0x87   :  { %702 = vmatpush.msra.mxu2 %v2485_v32  ;;  %811 = vmatpush.msra.mxu0 %v2413_v36 }
  0x88   :  { %831 = vmatpush.msra.mxu1 %v2418_v57 }
  0x89   :  { %812 = vmatpush.msra.mxu0 %v2431_v50 }
  0x8a   :  { %832 = vmatpush.msra.mxu1 %v2436_v55 }
  0x8b   :  { %813 = vmatpush.msra.mxu0 %v2449_v34 }
  0x8c   :  { %833 = vmatpush.msra.mxu1 %v2454_v54 }
  0x8d   :  { %814 = vmatpush.msra.mxu0 %v2467_v40 }
  0x8e   :  { %834 = vmatpush.msra.mxu1 %v2472_v48 }
  0x8f   :  { %815 = vmatpush.msra.mxu0 %v2485_v32 }
  0x90   :  { %835 = vmatpush.msra.mxu1 %v2490_v58 }
  0xe7   :  { %v397_v41 = vpop.f32.mrf.mxu3 }
  0xe9   :  { %v377_v42 = vpop.f32.mrf.mxu2 }
  0xed   :  { %v317_v52 = vpop.f32.mrf.mxu0  ;;  %v337_v16 = vpop.f32.mrf.mxu1 }
  0xee   :  { %v2602_v53 = vadd.f32 %v317_v52, %v296_v59  ;;  %v2604_v43 = vadd.f32 %v337_v16, %v297_v35 }
  0xf0   :  { %v400_v49 = vadd.f32 %v377_v42, %v2602_v53  ;;  %v401_v17 = vadd.f32 %v397_v41, %v2604_v43 }
  0xf2   :  { %v1630_v0 = vmul.f32 -1.442695, %v400_v49  ;;  %v1631_v61 = vmul.f32 -1.442695, %v401_v17 }
  0xf4   :  { %1677 = vpow2.f32 %v1630_v0 }
  0xf5   :  { %1679 = vpow2.f32 %v1631_v61 }
  0xfa   :  { %v1678_v44 = vpop.eup %1677 }
  0xfb   :  { %v1680_v18 = vpop.eup %1679  ;;  %v408_v1 = vadd.f32 1.0, %v1678_v44 }
  0xfc   :  { %v409_v60 = vadd.f32 1.0, %v1680_v18 }
  0xfd   :  { %1681 = vrcp.f32 %v408_v1  ;;  %v421_v61 = vand.u32 2147483648, %v408_v1  ;;  %vm415_vm4 = vweird.f32 %v408_v1  ;;  %v419_v44 = vand.u32 2147483647, %v408_v1 }
  0xfe   :  { %1683 = vrcp.f32 %v409_v60  ;;  %v436_v42 = vand.u32 2147483648, %v409_v60  ;;  %v434_v49 = vand.u32 2147483647, %v409_v60  ;;  %vm430_vm2 = vweird.f32 %v409_v60 }
  0xff   :  { %vm420_vm7 = vcmp.eq.f32.partialorder %v419_v44, 8.507059e+37 }
 0x100   :  { %v437_v18 = vor.u32 1.1754944e-38, %v436_v42  ;;  %vm435_vm5 = vcmp.eq.f32.partialorder %v434_v49, 8.507059e+37 }
 0x103   :  { %v1682_v62 = vpop.eup %1681 }
 0x104   :  { %v1684_v45 = vpop.eup %1683  ;;  %v411_v59 = vmul.f32 %v1682_v62, %v408_v1  ;;  %vm416_vm1 = vweird.f32 %v1682_v62 }
 0x105   :  { %v426_v52 = vmul.f32 %v1684_v45, %v409_v60  ;;  %vm431_vm0 = vweird.f32 %v1684_v45  ;;  %vm417_vm6 = vmor %vm415_vm4, %vm416_vm1 }
 0x106   :  { %v412_v35 = vsub.f32 1.0, %v411_v59  ;;  %vm432_vm3 = vmor %vm430_vm2, %vm431_vm0 }
 0x107   :  { %v427_v16 = vsub.f32 1.0, %v426_v52 }
 0x108   :  { %v413_v19 = vmul.f32 %v1682_v62, %v412_v35  ;;  %v422_v35 = vor.u32 1.1754944e-38, %v421_v61 }
 0x109   :  { %v428_v2 = vmul.f32 %v1684_v45, %v427_v16 }
 0x10a   :  { %v414_v17 = vadd.f32 %v1682_v62, %v413_v19 }
 0x10b   :  { %v429_v0 = vadd.f32 %v1684_v45, %v428_v2 }
 0x10c   :  { %v418_v59 = vsel %vm417_vm6, %v1682_v62, %v414_v17 }
 0x10d   :  { %v433_v41 = vsel %vm432_vm3, %v1684_v45, %v429_v0  ;;  %v423_v46 = vsel %vm420_vm7, %v422_v35, %v418_v59 }
 0x10e   :  { %v438_v63 = vsel %vm435_vm5, %v437_v18, %v433_v41  ;;  %v442_v2 = vmul.f32 0.0, %v423_v46 }
 0x10f   :  { %v440_v52 = vmul.f32 2.0, %v438_v63 }
 0x111   :  { %v1632_v16 = vadd.f32 -1.0, %v440_v52 }
 0x113   :  { %v443_v20 = vmul.f32 %v1632_v16, %v423_v46 }
 0x115   :  { %445 = vrot.lane.b32.xlu0 %v443_v20, %s1793_s2 }
 0x187   :  { %v446_v19 = vpop.permute.xlu0 %445 }
 0x188   :  { %v2609_v60 = vadd.f32 %v446_v19, %v442_v2 }
 0x18a   :  { %1685 = vtanh.f32 %v2609_v60 }
 0x190   :  { %v1686_v1 = vpop.eup %1685 }
 0x191   :  { %v450_v45 = vmul.f32 %v1686_v1, %v438_v63 }
 0x193   :  { %452 = vrot.lane.b32.xlu0 %v450_v45, %s1793_s2 }
 0x205   :  { %v453_v62 = vpop.permute.xlu0 %452 }
 0x206   :  { %1633 = vmatmul.msk.f32.vlgmr.msrb.gmra.mxu2 %vm356_vm8, %v453_v62  ;;  %1634 = vmatmul.msk.f32.vlgmr.msrb.gmra.mxu3 %vm356_vm8, %v453_v62  ;;  %456 = vst.msk [vmem:[#allocation2] sm:$0x1] %vm455_vm9, %v453_v62 }
 0x207   :  { %921 = vmatpush.msrb.mxu2 %v2370_v56  ;;  %941 = vmatpush.msrb.mxu3 %v2375_v38  ;;  %458 = vst.msk [vmem:[#allocation2 + $0x7] sm:$0x1] %vm457_vm10, %v453_v62 }
 0x209   :  { %922 = vmatpush.msrb.mxu2 %v2385_v37  ;;  %942 = vmatpush.msrb.mxu3 %v2390_v51 }
 0x20b   :  { %923 = vmatpush.msrb.mxu2 %v2395_v39  ;;  %943 = vmatpush.msrb.mxu3 %v2408_v33 }
 0x20d   :  { %924 = vmatpush.msrb.mxu2 %v2413_v36  ;;  %944 = vmatpush.msrb.mxu3 %v2418_v57 }
 0x20f   :  { %925 = vmatpush.msrb.mxu2 %v2431_v50  ;;  %945 = vmatpush.msrb.mxu3 %v2436_v55 }
 0x211   :  { %926 = vmatpush.msrb.mxu2 %v2449_v34  ;;  %946 = vmatpush.msrb.mxu3 %v2454_v54 }
 0x213   :  { %927 = vmatpush.msrb.mxu2 %v2467_v40  ;;  %947 = vmatpush.msrb.mxu3 %v2472_v48 }
 0x215   :  { %928 = vmatpush.msrb.mxu2 %v2485_v32  ;;  %948 = vmatpush.msrb.mxu3 %v2490_v58 }
 0x289   :  { %v478_v20 = vpop.f32.mrf.mxu2  ;;  %v498_v46 = vpop.f32.mrf.mxu3 }
 0x28a   :  { %v503_v63 = vrot.slane %v478_v20, 7  ;;  %v504_v42 = vrot.slane %v498_v46, 7 }
 0x28c   :  { %v507_v49 = vadd.f32 %v503_v63, %v2602_v53  ;;  %v508_v17 = vadd.f32 %v504_v42, %v2604_v43 }
 0x28e   :  { %v1635_v0 = vmul.f32 -1.442695, %v507_v49  ;;  %v1636_v61 = vmul.f32 -1.442695, %v508_v17 }
 0x290   :  { %1687 = vpow2.f32 %v1635_v0 }
 0x291   :  { %1689 = vpow2.f32 %v1636_v61  ;;  %v550_v61 = vrot.slane %v2609_v60, 7 }
 0x296   :  { %v1688_v18 = vpop.eup %1687 }
 0x297   :  { %v1690_v44 = vpop.eup %1689  ;;  %v515_v41 = vadd.f32 1.0, %v1688_v18 }
 0x298   :  { %v516_v59 = vadd.f32 1.0, %v1690_v44 }
 0x299   :  { %1691 = vrcp.f32 %v515_v41  ;;  %v528_v1 = vand.u32 2147483648, %v515_v41  ;;  %v526_v20 = vand.u32 2147483647, %v515_v41  ;;  %vm522_vm13 = vweird.f32 %v515_v41 }
 0x29a   :  { %1693 = vrcp.f32 %v516_v59  ;;  %v543_v46 = vand.u32 2147483648, %v516_v59  ;;  %v541_v42 = vand.u32 2147483647, %v516_v59  ;;  %vm537_vm15 = vweird.f32 %v516_v59 }
 0x29b   :  { %v529_v17 = vor.u32 1.1754944e-38, %v528_v1  ;;  %vm527_vm0 = vcmp.eq.f32.partialorder %v526_v20, 8.507059e+37 }
 0x29c   :  { %v544_v44 = vor.u32 1.1754944e-38, %v543_v46  ;;  %vm542_vm2 = vcmp.eq.f32.partialorder %v541_v42, 8.507059e+37 }
 0x29f   :  { %v1692_v52 = vpop.eup %1691 }
 0x2a0   :  { %v1694_v35 = vpop.eup %1693  ;;  %v518_v16 = vmul.f32 %v1692_v52, %v515_v41  ;;  %vm523_vm11 = vweird.f32 %v1692_v52 }
 0x2a1   :  { %v533_v2 = vmul.f32 %v1694_v35, %v516_v59  ;;  %vm538_vm12 = vweird.f32 %v1694_v35  ;;  %vm524_vm14 = vmor %vm522_vm13, %vm523_vm11 }
 0x2a2   :  { %v519_v19 = vsub.f32 1.0, %v518_v16  ;;  %vm539_vm1 = vmor %vm537_vm15, %vm538_vm12 }
 0x2a3   :  { %v534_v45 = vsub.f32 1.0, %v533_v2 }
 0x2a4   :  { %v520_v62 = vmul.f32 %v1692_v52, %v519_v19 }
 0x2a5   :  { %v535_v63 = vmul.f32 %v1694_v35, %v534_v45 }
 0x2a6   :  { %v521_v49 = vadd.f32 %v1692_v52, %v520_v62 }
 0x2a7   :  { %v536_v0 = vadd.f32 %v1694_v35, %v535_v63 }
 0x2a8   :  { %v525_v18 = vsel %vm524_vm14, %v1692_v52, %v521_v49 }
 0x2a9   :  { %v530_v16 = vsel %vm527_vm0, %v529_v17, %v525_v18  ;;  %v540_v2 = vsel %vm539_vm1, %v1694_v35, %v536_v0 }
 0x2aa   :  { %v545_v19 = vsel %vm542_vm2, %v544_v44, %v540_v2  ;;  %v552_v3 = vmul.f32 %v550_v61, %v530_v16 }
 0x2ab   :  { %v547_v45 = vmul.f32 2.0, %v545_v19 }
 0x2ad   :  { %v1637_v47 = vadd.f32 -1.0, %v547_v45 }
 0x2af   :  { %v553_v4 = vmul.f32 %v1637_v47, %v530_v16 }
 0x2b1   :  { %555 = vrot.lane.b32.xlu1 %v553_v4, %s1793_s2 }
 0x323   :  { %v556_v41 = vpop.permute.xlu1 %555 }
 0x324   :  { %v2635_v1 = vadd.f32 %v556_v41, %v552_v3 }
 0x326   :  { %1695 = vtanh.f32 %v2635_v1 }
 0x32c   :  { %v1696_v60 = vpop.eup %1695 }
 0x32d   :  { %v2638_v59 = vmul.f32 %v1696_v60, %v545_v19 }
 0x32f   :  { %v569_v52 = vrot.slane %v2638_v59, 1 }
 0x331   :  { %570 = vrot.lane.b32.xlu1 %v569_v52, %s1793_s2 }
 0x3a3   :  { %v571_v35 = vpop.permute.xlu1 %570 }
 0x3a4   :  { %1638 = vmatmul.msk.f32.vlgmr.msrb.gmra.mxu0 %vm356_vm8, %v571_v35  ;;  %1639 = vmatmul.msk.f32.vlgmr.msrb.gmra.mxu1 %vm356_vm8, %v571_v35 }
 0x3a5   :  { %1034 = vmatpush.msrb.mxu0 %v2370_v56  ;;  %1054 = vmatpush.msrb.mxu1 %v2375_v38 }
 0x3a7   :  { %1035 = vmatpush.msrb.mxu0 %v2385_v37  ;;  %1055 = vmatpush.msrb.mxu1 %v2390_v51 }
 0x3a9   :  { %1036 = vmatpush.msrb.mxu0 %v2395_v39  ;;  %1056 = vmatpush.msrb.mxu1 %v2408_v33 }
 0x3ab   :  { %1037 = vmatpush.msrb.mxu0 %v2413_v36  ;;  %1057 = vmatpush.msrb.mxu1 %v2418_v57 }
 0x3ad   :  { %1038 = vmatpush.msrb.mxu0 %v2431_v50  ;;  %1058 = vmatpush.msrb.mxu1 %v2436_v55 }
 0x3af   :  { %1039 = vmatpush.msrb.mxu0 %v2449_v34  ;;  %1059 = vmatpush.msrb.mxu1 %v2454_v54 }
 0x3b1   :  { %1040 = vmatpush.msrb.mxu0 %v2467_v40  ;;  %1060 = vmatpush.msrb.mxu1 %v2472_v48 }
 0x3b3   :  { %1041 = vmatpush.msrb.mxu0 %v2485_v32  ;;  %1061 = vmatpush.msrb.mxu1 %v2490_v58 }
 0x421   :  { %v591_v3 = vpop.f32.mrf.mxu0  ;;  %v611_v4 = vpop.f32.mrf.mxu1 }
 0x422   :  { %v616_v47 = vrot.slane %v591_v3, 6  ;;  %v617_v62 = vrot.slane %v611_v4, 6 }
 0x424   :  { %v620_v20 = vadd.f32 %v616_v47, %v2602_v53  ;;  %v621_v46 = vadd.f32 %v617_v62, %v2604_v43 }
 0x426   :  { %v1640_v63 = vmul.f32 -1.442695, %v620_v20  ;;  %v1641_v42 = vmul.f32 -1.442695, %v621_v46  ;;  %v663_v46 = vrot.slane %v2635_v1, 7 }
 0x428   :  { %1697 = vpow2.f32 %v1640_v63 }
 0x429   :  { %1699 = vpow2.f32 %v1641_v42 }
 0x42e   :  { %v1698_v49 = vpop.eup %1697 }
 0x42f   :  { %v1700_v17 = vpop.eup %1699  ;;  %v628_v0 = vadd.f32 1.0, %v1698_v49 }
 0x430   :  { %v629_v61 = vadd.f32 1.0, %v1700_v17 }
 0x431   :  { %1701 = vrcp.f32 %v628_v0  ;;  %v641_v45 = vand.u32 2147483648, %v628_v0  ;;  %v639_v52 = vand.u32 2147483647, %v628_v0  ;;  %vm635_vm5 = vweird.f32 %v628_v0 }
 0x432   :  { %1703 = vrcp.f32 %v629_v61  ;;  %v656_v35 = vand.u32 2147483648, %v629_v61  ;;  %v654_v4 = vand.u32 2147483647, %v629_v61  ;;  %vm650_vm7 = vweird.f32 %v629_v61 }
 0x433   :  { %v642_v62 = vor.u32 1.1754944e-38, %v641_v45  ;;  %vm640_vm9 = vcmp.eq.f32.partialorder %v639_v52, 8.507059e+37 }
 0x434   :  { %v657_v42 = vor.u32 1.1754944e-38, %v656_v35  ;;  %vm655_vm11 = vcmp.eq.f32.partialorder %v654_v4, 8.507059e+37 }
 0x437   :  { %v1702_v18 = vpop.eup %1701 }
 0x438   :  { %v1704_v44 = vpop.eup %1703  ;;  %v631_v16 = vmul.f32 %v1702_v18, %v628_v0  ;;  %vm636_vm3 = vweird.f32 %v1702_v18 }
 0x439   :  { %v646_v2 = vmul.f32 %v1704_v44, %v629_v61  ;;  %vm651_vm4 = vweird.f32 %v1704_v44  ;;  %vm637_vm6 = vmor %vm635_vm5, %vm636_vm3 }
 0x43a   :  { %v632_v19 = vsub.f32 1.0, %v631_v16  ;;  %vm652_vm10 = vmor %vm650_vm7, %vm651_vm4 }
 0x43b   :  { %v647_v41 = vsub.f32 1.0, %v646_v2 }
 0x43c   :  { %v633_v60 = vmul.f32 %v1702_v18, %v632_v19 }
 0x43d   :  { %v648_v3 = vmul.f32 %v1704_v44, %v647_v41 }
 0x43e   :  { %v634_v47 = vadd.f32 %v1702_v18, %v633_v60 }
 0x43f   :  { %v649_v20 = vadd.f32 %v1704_v44, %v648_v3 }
 0x440   :  { %v638_v63 = vsel %vm637_vm6, %v1702_v18, %v634_v47 }
 0x441   :  { %v643_v49 = vsel %vm640_vm9, %v642_v62, %v638_v63  ;;  %v653_v17 = vsel %vm652_vm10, %v1704_v44, %v649_v20 }
 0x442   :  { %v658_v16 = vsel %vm655_vm11, %v657_v42, %v653_v17  ;;  %v665_v2 = vmul.f32 %v663_v46, %v643_v49 }
 0x443   :  { %v660_v19 = vmul.f32 2.0, %v658_v16 }
 0x445   :  { %v1642_v41 = vadd.f32 -1.0, %v660_v19 }
 0x447   :  { %v666_v21 = vmul.f32 %v1642_v41, %v643_v49 }
 0x449   :  { %668 = vrot.lane.b32.xlu2 %v666_v21, %s1793_s2 }
 0x4a3   :  { %v669_v0 = vpop.permute.xlu2 %668 }
 0x4a4   :  { %v2664_v45 = vadd.f32 %v669_v0, %v665_v2 }
 0x4a6   :  { %1705 = vtanh.f32 %v2664_v45  ;;  %v776_v42 = vrot.slane %v2664_v45, 7 }
 0x4ac   :  { %v1706_v1 = vpop.eup %1705 }
 0x4ad   :  { %v2667_v61 = vmul.f32 %v1706_v1, %v658_v16 }
 0x4af   :  { %v682_v18 = vrot.slane %v2667_v61, 2 }
 0x4b1   :  { %683 = vrot.lane.b32.xlu2 %v682_v18, %s1793_s2 }
 0x50b   :  { %v684_v44 = vpop.permute.xlu2 %683 }
 0x50c   :  { %1643 = vmatmul.msk.f32.vlgmr.msra.gmra.mxu2 %vm356_vm8, %v684_v44  ;;  %1644 = vmatmul.msk.f32.vlgmr.msra.gmra.mxu3 %vm356_vm8, %v684_v44 }
 0x50d   :  { %1147 = vmatpush.msra.mxu2 %v2370_v56  ;;  %1167 = vmatpush.msra.mxu3 %v2375_v38 }
 0x50f   :  { %1148 = vmatpush.msra.mxu2 %v2385_v37  ;;  %1168 = vmatpush.msra.mxu3 %v2390_v51 }
 0x511   :  { %1149 = vmatpush.msra.mxu2 %v2395_v39  ;;  %1169 = vmatpush.msra.mxu3 %v2408_v33 }
 0x513   :  { %1150 = vmatpush.msra.mxu2 %v2413_v36  ;;  %1170 = vmatpush.msra.mxu3 %v2418_v57 }
 0x515   :  { %1151 = vmatpush.msra.mxu2 %v2431_v50  ;;  %1171 = vmatpush.msra.mxu3 %v2436_v55 }
 0x517   :  { %1152 = vmatpush.msra.mxu2 %v2449_v34  ;;  %1172 = vmatpush.msra.mxu3 %v2454_v54 }
 0x519   :  { %1153 = vmatpush.msra.mxu2 %v2467_v40  ;;  %1173 = vmatpush.msra.mxu3 %v2472_v48 }
 0x51b   :  { %1154 = vmatpush.msra.mxu2 %v2485_v32  ;;  %1174 = vmatpush.msra.mxu3 %v2490_v58 }
 0x58f   :  { %v704_v21 = vpop.f32.mrf.mxu2  ;;  %v724_v39 = vpop.f32.mrf.mxu3 }
 0x590   :  { %v729_v56 = vrot.slane %v704_v21, 5  ;;  %v730_v57 = vrot.slane %v724_v39, 5 }
 0x592   :  { %v733_v38 = vadd.f32 %v729_v56, %v2602_v53  ;;  %v734_v37 = vadd.f32 %v730_v57, %v2604_v43 }
 0x594   :  { %v1645_v51 = vmul.f32 -1.442695, %v733_v38  ;;  %v1646_v33 = vmul.f32 -1.442695, %v734_v37 }
 0x596   :  { %1707 = vpow2.f32 %v1645_v51 }
 0x597   :  { %1709 = vpow2.f32 %v1646_v33 }
 0x59c   :  { %v1708_v36 = vpop.eup %1707 }
 0x59d   :  { %v1710_v50 = vpop.eup %1709  ;;  %v741_v55 = vadd.f32 1.0, %v1708_v36 }
 0x59e   :  { %v742_v34 = vadd.f32 1.0, %v1710_v50 }
 0x59f   :  { %1711 = vrcp.f32 %v741_v55  ;;  %v754_v60 = vand.u32 2147483648, %v741_v55  ;;  %v752_v3 = vand.u32 2147483647, %v741_v55  ;;  %vm748_vm14 = vweird.f32 %v741_v55 }
 0x5a0   :  { %1713 = vrcp.f32 %v742_v34  ;;  %v769_v4 = vand.u32 2147483648, %v742_v34  ;;  %v767_v62 = vand.u32 2147483647, %v742_v34  ;;  %vm763_vm0 = vweird.f32 %v742_v34 }
 0x5a1   :  { %v755_v46 = vor.u32 1.1754944e-38, %v754_v60  ;;  %vm753_vm1 = vcmp.eq.f32.partialorder %v752_v3, 8.507059e+37 }
 0x5a2   :  { %v770_v17 = vor.u32 1.1754944e-38, %v769_v4  ;;  %vm768_vm3 = vcmp.eq.f32.partialorder %v767_v62, 8.507059e+37 }
 0x5a5   :  { %v1712_v54 = vpop.eup %1711 }
 0x5a6   :  { %v1714_v40 = vpop.eup %1713  ;;  %v744_v48 = vmul.f32 %v1712_v54, %v741_v55  ;;  %vm749_vm12 = vweird.f32 %v1712_v54 }
 0x5a7   :  { %v759_v32 = vmul.f32 %v1714_v40, %v742_v34  ;;  %vm764_vm13 = vweird.f32 %v1714_v40  ;;  %vm750_vm15 = vmor %vm748_vm14, %vm749_vm12 }
 0x5a8   :  { %v745_v58 = vsub.f32 1.0, %v744_v48  ;;  %vm765_vm2 = vmor %vm763_vm0, %vm764_vm13 }
 0x5a9   :  { %v760_v52 = vsub.f32 1.0, %v759_v32 }
 0x5aa   :  { %v746_v35 = vmul.f32 %v1712_v54, %v745_v58 }
 0x5ab   :  { %v761_v47 = vmul.f32 %v1714_v40, %v760_v52 }
 0x5ac   :  { %v747_v20 = vadd.f32 %v1712_v54, %v746_v35 }
 0x5ad   :  { %v762_v63 = vadd.f32 %v1714_v40, %v761_v47 }
 0x5ae   :  { %v751_v49 = vsel %vm750_vm15, %v1712_v54, %v747_v20 }
 0x5af   :  { %v756_v16 = vsel %vm753_vm1, %v755_v46, %v751_v49  ;;  %v766_v2 = vsel %vm765_vm2, %v1714_v40, %v762_v63 }
 0x5b0   :  { %v771_v19 = vsel %vm768_vm3, %v770_v17, %v766_v2  ;;  %v778_v41 = vmul.f32 %v776_v42, %v756_v16 }
 0x5b1   :  { %v773_v0 = vmul.f32 2.0, %v771_v19 }
 0x5b3   :  { %v1647_v1 = vadd.f32 -1.0, %v773_v0 }
 0x5b5   :  { %v779_v18 = vmul.f32 %v1647_v1, %v756_v16 }
 0x5b7   :  { %781 = vrot.lane.b32.xlu0 %v779_v18, %s1793_s2 }
 0x629   :  { %v782_v44 = vpop.permute.xlu0 %781 }
 0x62a   :  { %v784_v21 = vadd.f32 %v782_v44, %v778_v41 }
 0x62c   :  { %1715 = vtanh.f32 %v784_v21  ;;  %v889_v2 = vrot.slane %v784_v21, 7 }
 0x632   :  { %v1716_v39 = vpop.eup %1715 }
 0x633   :  { %v2693_v56 = vmul.f32 %v1716_v39, %v771_v19 }
 0x635   :  { %v795_v45 = vrot.slane %v2693_v56, 3 }
 0x637   :  { %796 = vrot.lane.b32.xlu1 %v795_v45, %s1793_s2 }
 0x6a9   :  { %v797_v57 = vpop.permute.xlu1 %796 }
 0x6aa   :  { %1648 = vmatmul.msk.f32.vlgmr.msra.gmra.mxu0 %vm356_vm8, %v797_v57  ;;  %1649 = vmatmul.msk.f32.vlgmr.msra.gmra.mxu1 %vm356_vm8, %v797_v57 }
 0x727   :  { %v817_v38 = vpop.f32.mrf.mxu0  ;;  %v837_v37 = vpop.f32.mrf.mxu1 }
 0x728   :  { %v842_v51 = vrot.slane %v817_v38, 4  ;;  %v843_v33 = vrot.slane %v837_v37, 4 }
 0x72a   :  { %v846_v36 = vadd.f32 %v842_v51, %v2602_v53  ;;  %v847_v50 = vadd.f32 %v843_v33, %v2604_v43 }
 0x72c   :  { %v1650_v55 = vmul.f32 -1.442695, %v846_v36  ;;  %v1651_v34 = vmul.f32 -1.442695, %v847_v50 }
 0x72e   :  { %1717 = vpow2.f32 %v1650_v55 }
 0x72f   :  { %1719 = vpow2.f32 %v1651_v34 }
 0x734   :  { %v1718_v54 = vpop.eup %1717 }
 0x735   :  { %v1720_v40 = vpop.eup %1719  ;;  %v854_v48 = vadd.f32 1.0, %v1718_v54 }
 0x736   :  { %v855_v32 = vadd.f32 1.0, %v1720_v40 }
 0x737   :  { %1721 = vrcp.f32 %v854_v48  ;;  %v867_v4 = vand.u32 2147483648, %v854_v48  ;;  %v865_v20 = vand.u32 2147483647, %v854_v48  ;;  %vm861_vm6 = vweird.f32 %v854_v48 }
 0x738   :  { %1723 = vrcp.f32 %v855_v32  ;;  %v882_v46 = vand.u32 2147483648, %v855_v32  ;;  %v880_v42 = vand.u32 2147483647, %v855_v32  ;;  %vm876_vm9 = vweird.f32 %v855_v32 }
 0x739   :  { %v868_v17 = vor.u32 1.1754944e-38, %v867_v4  ;;  %vm866_vm10 = vcmp.eq.f32.partialorder %v865_v20, 8.507059e+37 }
 0x73a   :  { %v883_v41 = vor.u32 1.1754944e-38, %v882_v46  ;;  %vm881_vm12 = vcmp.eq.f32.partialorder %v880_v42, 8.507059e+37 }
 0x73d   :  { %v1722_v58 = vpop.eup %1721 }
 0x73e   :  { %v1724_v60 = vpop.eup %1723  ;;  %v857_v52 = vmul.f32 %v1722_v58, %v854_v48  ;;  %vm862_vm4 = vweird.f32 %v1722_v58 }
 0x73f   :  { %v872_v35 = vmul.f32 %v1724_v60, %v855_v32  ;;  %vm877_vm5 = vweird.f32 %v1724_v60  ;;  %vm863_vm7 = vmor %vm861_vm6, %vm862_vm4 }
 0x740   :  { %v858_v3 = vsub.f32 1.0, %v857_v52  ;;  %vm878_vm11 = vmor %vm876_vm9, %vm877_vm5 }
 0x741   :  { %v873_v47 = vsub.f32 1.0, %v872_v35 }
 0x742   :  { %v859_v62 = vmul.f32 %v1722_v58, %v858_v3 }
 0x743   :  { %v874_v63 = vmul.f32 %v1724_v60, %v873_v47 }
 0x744   :  { %v860_v49 = vadd.f32 %v1722_v58, %v859_v62 }
 0x745   :  { %v875_v16 = vadd.f32 %v1724_v60, %v874_v63 }
 0x746   :  { %v864_v19 = vsel %vm863_vm7, %v1722_v58, %v860_v49 }
 0x747   :  { %v869_v0 = vsel %vm866_vm10, %v868_v17, %v864_v19  ;;  %v879_v1 = vsel %vm878_vm11, %v1724_v60, %v875_v16 }
 0x748   :  { %v884_v18 = vsel %vm881_vm12, %v883_v41, %v879_v1  ;;  %v891_v44 = vmul.f32 %v889_v2, %v869_v0 }
 0x749   :  { %v886_v39 = vmul.f32 2.0, %v884_v18 }
 0x74b   :  { %v1652_v45 = vadd.f32 -1.0, %v886_v39 }
 0x74d   :  { %v892_v57 = vmul.f32 %v1652_v45, %v869_v0 }
 0x74f   :  { %894 = vrot.lane.b32.xlu2 %v892_v57, %s1793_s2 }
 0x7a9   :  { %v895_v38 = vpop.permute.xlu2 %894 }
 0x7aa   :  { %v897_v37 = vadd.f32 %v895_v38, %v891_v44 }
 0x7ac   :  { %1725 = vtanh.f32 %v897_v37 }
 0x7b2   :  { %v1726_v51 = vpop.eup %1725 }
 0x7b3   :  { %v2702_v33 = vmul.f32 %v1726_v51, %v884_v18  ;;  %v1002_v18 = vrot.slane %v897_v37, 7 }
 0x7b5   :  { %v908_v21 = vrot.slane %v2702_v33, 4 }
 0x7b7   :  { %909 = vrot.lane.b32.xlu0 %v908_v21, %s1793_s2 }
 0x829   :  { %v910_v36 = vpop.permute.xlu0 %909 }
 0x82a   :  { %1653 = vmatmul.msk.f32.vlgmr.msrb.gmra.mxu2 %vm356_vm8, %v910_v36  ;;  %1654 = vmatmul.msk.f32.vlgmr.msrb.gmra.mxu3 %vm356_vm8, %v910_v36 }
 0x8ad   :  { %v930_v50 = vpop.f32.mrf.mxu2  ;;  %v950_v55 = vpop.f32.mrf.mxu3 }
 0x8ae   :  { %v955_v34 = vrot.slane %v930_v50, 3  ;;  %v956_v54 = vrot.slane %v950_v55, 3 }
 0x8b0   :  { %v959_v40 = vadd.f32 %v955_v34, %v2602_v53  ;;  %v960_v48 = vadd.f32 %v956_v54, %v2604_v43 }
 0x8b2   :  { %v1655_v32 = vmul.f32 -1.442695, %v959_v40  ;;  %v1656_v58 = vmul.f32 -1.442695, %v960_v48 }
 0x8b4   :  { %1727 = vpow2.f32 %v1655_v32 }
 0x8b5   :  { %1729 = vpow2.f32 %v1656_v58 }
 0x8ba   :  { %v1728_v60 = vpop.eup %1727 }
 0x8bb   :  { %v1730_v52 = vpop.eup %1729  ;;  %v967_v35 = vadd.f32 1.0, %v1728_v60 }
 0x8bc   :  { %v968_v3 = vadd.f32 1.0, %v1730_v52 }
 0x8bd   :  { %1731 = vrcp.f32 %v967_v35  ;;  %v980_v63 = vand.u32 2147483648, %v967_v35  ;;  %v978_v17 = vand.u32 2147483647, %v967_v35  ;;  %vm974_vm15 = vweird.f32 %v967_v35 }
 0x8be   :  { %1733 = vrcp.f32 %v968_v3  ;;  %v995_v16 = vand.u32 2147483648, %v968_v3  ;;  %v993_v19 = vand.u32 2147483647, %v968_v3  ;;  %vm989_vm1 = vweird.f32 %v968_v3 }
 0x8bf   :  { %v981_v0 = vor.u32 1.1754944e-38, %v980_v63  ;;  %vm979_vm2 = vcmp.eq.f32.partialorder %v978_v17, 8.507059e+37 }
 0x8c0   :  { %v996_v39 = vor.u32 1.1754944e-38, %v995_v16  ;;  %vm994_vm4 = vcmp.eq.f32.partialorder %v993_v19, 8.507059e+37 }
 0x8c3   :  { %v1732_v4 = vpop.eup %1731 }
 0x8c4   :  { %v1734_v47 = vpop.eup %1733  ;;  %v970_v62 = vmul.f32 %v1732_v4, %v967_v35  ;;  %vm975_vm13 = vweird.f32 %v1732_v4 }
 0x8c5   :  { %v985_v20 = vmul.f32 %v1734_v47, %v968_v3  ;;  %vm990_vm14 = vweird.f32 %v1734_v47  ;;  %vm976_vm0 = vmor %vm974_vm15, %vm975_vm13  ;;  %vm567_vm15 = vcmask 517377  }
 0x8c6   :  { %v971_v46 = vsub.f32 1.0, %v970_v62  ;;  %vm991_vm3 = vmor %vm989_vm1, %vm990_vm14  ;;  %vm565_vm14 = vcmask 254977   ;;  %vm680_vm1 = vcmask 518402  }
 0x8c7   :  { %v986_v42 = vsub.f32 1.0, %v985_v20 }
 0x8c8   :  { %v972_v49 = vmul.f32 %v1732_v4, %v971_v46 }
 0x8c9   :  { %v987_v2 = vmul.f32 %v1734_v47, %v986_v42 }
 0x8ca   :  { %v973_v41 = vadd.f32 %v1732_v4, %v972_v49 }
 0x8cb   :  { %v988_v1 = vadd.f32 %v1734_v47, %v987_v2 }
 0x8cc   :  { %v977_v44 = vsel %vm976_vm0, %v1732_v4, %v973_v41  ;;  %vm678_vm0 = vcmask 256002  }
 0x8cd   :  { %v982_v45 = vsel %vm979_vm2, %v981_v0, %v977_v44  ;;  %v992_v57 = vsel %vm991_vm3, %v1734_v47, %v988_v1  ;;  %vm1017_vm2 = vcmask 259077   ;;  %vm1019_vm3 = vcmask 521477  }
 0x8ce   :  { %v997_v38 = vsel %vm994_vm4, %v996_v39, %v992_v57  ;;  %v1004_v51 = vmul.f32 %v1002_v18, %v982_v45 }
 0x8cf   :  { %v999_v21 = vmul.f32 2.0, %v997_v38 }
 0x8d1   :  { %v1657_v36 = vadd.f32 -1.0, %v999_v21 }
 0x8d3   :  { %v1005_v50 = vmul.f32 %v1657_v36, %v982_v45 }
 0x8d5   :  { %1007 = vrot.lane.b32.xlu1 %v1005_v50, %s1793_s2 }
 0x947   :  { %v1008_v55 = vpop.permute.xlu1 %1007 }
 0x948   :  { %v1010_v34 = vadd.f32 %v1008_v55, %v1004_v51 }
 0x94a   :  { %1735 = vtanh.f32 %v1010_v34  ;;  %v1115_v51 = vrot.slane %v1010_v34, 7 }
 0x950   :  { %v1736_v54 = vpop.eup %1735 }
 0x951   :  { %v2711_v40 = vmul.f32 %v1736_v54, %v997_v38 }
 0x953   :  { %v1021_v37 = vrot.slane %v2711_v40, 5 }
 0x955   :  { %1022 = vrot.lane.b32.xlu2 %v1021_v37, %s1793_s2 }
 0x9af   :  { %v1023_v48 = vpop.permute.xlu2 %1022 }
 0x9b0   :  { %1658 = vmatmul.msk.f32.vlgmr.msrb.gmra.mxu0 %vm356_vm8, %v1023_v48  ;;  %1659 = vmatmul.msk.f32.vlgmr.msrb.gmra.mxu1 %vm356_vm8, %v1023_v48 }
 0xa2d   :  { %v1043_v32 = vpop.f32.mrf.mxu0  ;;  %v1063_v58 = vpop.f32.mrf.mxu1 }
 0xa2e   :  { %v1068_v60 = vrot.slane %v1043_v32, 2  ;;  %v1069_v52 = vrot.slane %v1063_v58, 2 }
 0xa30   :  { %v1072_v35 = vadd.f32 %v1068_v60, %v2602_v53  ;;  %v1073_v3 = vadd.f32 %v1069_v52, %v2604_v43 }
 0xa32   :  { %v1660_v4 = vmul.f32 -1.442695, %v1072_v35  ;;  %v1661_v47 = vmul.f32 -1.442695, %v1073_v3 }
 0xa34   :  { %1737 = vpow2.f32 %v1660_v4 }
 0xa35   :  { %1739 = vpow2.f32 %v1661_v47 }
 0xa3a   :  { %v1738_v62 = vpop.eup %1737 }
 0xa3b   :  { %v1740_v20 = vpop.eup %1739  ;;  %v1080_v46 = vadd.f32 1.0, %v1738_v62 }
 0xa3c   :  { %v1081_v63 = vadd.f32 1.0, %v1740_v20 }
 0xa3d   :  { %1741 = vrcp.f32 %v1080_v46  ;;  %v1093_v41 = vand.u32 2147483648, %v1080_v46  ;;  %v1091_v1 = vand.u32 2147483647, %v1080_v46  ;;  %vm1087_vm7 = vweird.f32 %v1080_v46 }
 0xa3e   :  { %1743 = vrcp.f32 %v1081_v63  ;;  %v1108_v18 = vand.u32 2147483648, %v1081_v63  ;;  %v1106_v39 = vand.u32 2147483647, %v1081_v63  ;;  %vm1102_vm10 = vweird.f32 %v1081_v63 }
 0xa3f   :  { %v1094_v57 = vor.u32 1.1754944e-38, %v1093_v41  ;;  %vm1092_vm11 = vcmp.eq.f32.partialorder %v1091_v1, 8.507059e+37 }
 0xa40   :  { %v1109_v36 = vor.u32 1.1754944e-38, %v1108_v18  ;;  %vm1107_vm13 = vcmp.eq.f32.partialorder %v1106_v39, 8.507059e+37 }
 0xa43   :  { %v1742_v42 = vpop.eup %1741 }
 0xa44   :  { %v1744_v49 = vpop.eup %1743  ;;  %v1083_v17 = vmul.f32 %v1742_v42, %v1080_v46  ;;  %vm1088_vm5 = vweird.f32 %v1742_v42 }
 0xa45   :  { %v1098_v16 = vmul.f32 %v1744_v49, %v1081_v63  ;;  %vm1103_vm6 = vweird.f32 %v1744_v49  ;;  %vm1089_vm9 = vmor %vm1087_vm7, %vm1088_vm5 }
 0xa46   :  { %v1084_v2 = vsub.f32 1.0, %v1083_v17  ;;  %vm1104_vm12 = vmor %vm1102_vm10, %vm1103_vm6 }
 0xa47   :  { %v1099_v19 = vsub.f32 1.0, %v1098_v16 }
 0xa48   :  { %v1085_v0 = vmul.f32 %v1742_v42, %v1084_v2 }
 0xa49   :  { %v1100_v44 = vmul.f32 %v1744_v49, %v1099_v19 }
 0xa4a   :  { %v1086_v45 = vadd.f32 %v1742_v42, %v1085_v0 }
 0xa4b   :  { %v1101_v38 = vadd.f32 %v1744_v49, %v1100_v44 }
 0xa4c   :  { %v1090_v21 = vsel %vm1089_vm9, %v1742_v42, %v1086_v45 }
 0xa4d   :  { %v1095_v50 = vsel %vm1092_vm11, %v1094_v57, %v1090_v21  ;;  %v1105_v55 = vsel %vm1104_vm12, %v1744_v49, %v1101_v38 }
 0xa4e   :  { %v1110_v54 = vsel %vm1107_vm13, %v1109_v36, %v1105_v55  ;;  %v1117_v37 = vmul.f32 %v1115_v51, %v1095_v50  ;;  %vm791_vm13 = vcmask 257027  }
 0xa4f   :  { %v1112_v48 = vmul.f32 2.0, %v1110_v54 }
 0xa51   :  { %v1662_v32 = vadd.f32 -1.0, %v1112_v48 }
 0xa53   :  { %v1118_v58 = vmul.f32 %v1662_v32, %v1095_v50 }
 0xa55   :  { %1120 = vrot.lane.b32.xlu0 %v1118_v58, %s1793_s2 }
 0xa5d   :  { %562 = vrot.lane.b32.xlu0 %v2638_v59, %s1793_s2 }
 0xa65   :  { %901 = vrot.lane.b32.xlu0 %v2702_v33, %s1793_s2 }
 0xac7   :  { %v1121_v34 = vpop.permute.xlu0 %1120 }
 0xac8   :  { %v2724_v60 = vadd.f32 %v1121_v34, %v1117_v37 }
 0xaca   :  { %1745 = vtanh.f32 %v2724_v60  ;;  %v1228_v55 = vrot.slane %v2724_v60, 7 }
 0xacf   :  { %v563_v52 = vpop.permute.xlu0 %562 }
 0xad0   :  { %v1746_v35 = vpop.eup %1745  ;;  %566 = vst.msk [vmem:[#allocation2] sm:$0x2] %vm565_vm14, %v563_v52  ;;  %vm793_vm14 = vcmask 519427  }
 0xad1   :  { %568 = vst.msk [vmem:[#allocation2 + $0x5] sm:$0x2] %vm567_vm15, %v563_v52  ;;  %v2727_v3 = vmul.f32 %v1746_v35, %v1110_v54  ;;  %vm904_vm15 = vcmask 258052  }
 0xad3   :  { %v1134_v4 = vrot.slane %v2727_v3, 6 }
 0xad5   :  { %1135 = vrot.lane.b32.xlu1 %v1134_v4, %s1793_s2 }
 0xadd   :  { %675 = vrot.lane.b32.xlu1 %v2667_v61, %s1793_s2 }
 0xae5   :  { %1014 = vrot.lane.b32.xlu1 %v2711_v40, %s1793_s2 }
 0xb47   :  { %v1136_v59 = vpop.permute.xlu1 %1135 }
 0xb48   :  { %1663 = vmatmul.msk.f32.vlgmr.msra.gmra.mxu2 %vm356_vm8, %v1136_v59  ;;  %1664 = vmatmul.msk.f32.vlgmr.msra.gmra.mxu3 %vm356_vm8, %v1136_v59 }
 0xb4f   :  { %v676_v33 = vpop.permute.xlu1 %675 }
 0xb50   :  { %679 = vst.msk [vmem:[#allocation2] sm:$0x4] %vm678_vm0, %v676_v33  ;;  %vm906_vm0 = vcmask 520452  }
 0xb51   :  { %681 = vst.msk [vmem:[#allocation2 + $0x3] sm:$0x4] %vm680_vm1, %v676_v33  ;;  %vm1130_vm1 = vcmask 260102  }
 0xb57   :  { %v1015_v47 = vpop.permute.xlu1 %1014 }
 0xb58   :  { %1018 = vst.msk [vmem:[#allocation2] sm:$0x20] %vm1017_vm2, %v1015_v47  ;;  %vm1132_vm2 = vcmask 522502  }
 0xb59   :  { %1020 = vst.msk [vmem:[#allocation2 - $0x3] sm:$0x20] %vm1019_vm3, %v1015_v47  ;;  %vm1243_vm3 = vcmask 261127  }
 0xbcb   :  { %v1156_v62 = vpop.f32.mrf.mxu2  ;;  %v1176_v61 = vpop.f32.mrf.mxu3 }
 0xbcc   :  { %v1181_v20 = vrot.slane %v1156_v62, 1  ;;  %v1182_v46 = vrot.slane %v1176_v61, 1  ;;  %v902_v62 = vpop.permute.xlu0 %901 }
 0xbce   :  { %v1185_v40 = vadd.f32 %v1181_v20, %v2602_v53  ;;  %v1186_v63 = vadd.f32 %v1182_v46, %v2604_v43  ;;  %v1676_v20 = vld [vmem:[%s2918_s4] ss:$0 sm:$0xff] }
 0xbd0   :  { %v1665_v42 = vmul.f32 -1.442695, %v1185_v40  ;;  %v1666_v49 = vmul.f32 -1.442695, %v1186_v63 }
 0xbd2   :  { %1747 = vpow2.f32 %v1665_v42 }
 0xbd3   :  { %1749 = vpow2.f32 %v1666_v49 }
 0xbd8   :  { %v1748_v17 = vpop.eup %1747 }
 0xbd9   :  { %v1750_v16 = vpop.eup %1749  ;;  %v1193_v2 = vadd.f32 1.0, %v1748_v17 }
 0xbda   :  { %v1194_v19 = vadd.f32 1.0, %v1750_v16 }
 0xbdb   :  { %1751 = vrcp.f32 %v1193_v2  ;;  %v1206_v45 = vand.u32 2147483648, %v1193_v2  ;;  %v1204_v43 = vand.u32 2147483647, %v1193_v2  ;;  %vm1200_vm6 = vweird.f32 %v1193_v2 }
 0xbdc   :  { %1753 = vrcp.f32 %v1194_v19  ;;  %v1221_v57 = vand.u32 2147483648, %v1194_v19  ;;  %v1219_v51 = vand.u32 2147483647, %v1194_v19  ;;  %vm1215_vm9 = vweird.f32 %v1194_v19 }
 0xbdd   :  { %v1207_v36 = vor.u32 1.1754944e-38, %v1206_v45  ;;  %vm1205_vm10 = vcmp.eq.f32.partialorder %v1204_v43, 8.507059e+37 }
 0xbde   :  { %v1222_v37 = vor.u32 1.1754944e-38, %v1221_v57  ;;  %vm1220_vm12 = vcmp.eq.f32.partialorder %v1219_v51, 8.507059e+37 }
 0xbe1   :  { %v1752_v41 = vpop.eup %1751 }
 0xbe2   :  { %v1754_v0 = vpop.eup %1753  ;;  %v1196_v1 = vmul.f32 %v1752_v41, %v1193_v2  ;;  %vm1201_vm4 = vweird.f32 %v1752_v41 }
 0xbe3   :  { %v1211_v18 = vmul.f32 %v1754_v0, %v1194_v19  ;;  %vm1216_vm5 = vweird.f32 %v1754_v0  ;;  %vm1202_vm7 = vmor %vm1200_vm6, %vm1201_vm4  ;;  %vm1245_vm4 = vcmask 523527  }
 0xbe4   :  { %v1197_v44 = vsub.f32 1.0, %v1196_v1  ;;  %vm1217_vm11 = vmor %vm1215_vm9, %vm1216_vm5 }
 0xbe5   :  { %v1212_v39 = vsub.f32 1.0, %v1211_v18 }
 0xbe6   :  { %v1198_v53 = vmul.f32 %v1752_v41, %v1197_v44 }
 0xbe7   :  { %v1213_v38 = vmul.f32 %v1754_v0, %v1212_v39 }
 0xbe8   :  { %v1199_v21 = vadd.f32 %v1752_v41, %v1198_v53 }
 0xbe9   :  { %v1214_v50 = vadd.f32 %v1754_v0, %v1213_v38 }
 0xbea   :  { %v1203_v54 = vsel %vm1202_vm7, %v1752_v41, %v1199_v21 }
 0xbeb   :  { %v1208_v48 = vsel %vm1205_vm10, %v1207_v36, %v1203_v54  ;;  %v1218_v32 = vsel %vm1217_vm11, %v1754_v0, %v1214_v50 }
 0xbec   :  { %v1223_v58 = vsel %vm1220_vm12, %v1222_v37, %v1218_v32  ;;  %v1230_v34 = vmul.f32 %v1228_v55, %v1208_v48 }
 0xbed   :  { %v1225_v52 = vmul.f32 2.0, %v1223_v58 }
 0xbef   :  { %v1667_v35 = vadd.f32 -1.0, %v1225_v52 }
 0xbf1   :  { %v1231_v4 = vmul.f32 %v1667_v35, %v1208_v48 }
 0xbf3   :  { %1233 = vrot.lane.b32.xlu2 %v1231_v4, %s1793_s2 }
 0xbfb   :  { %788 = vrot.lane.b32.xlu2 %v2693_v56, %s1793_s2 }
 0xc03   :  { %1127 = vrot.lane.b32.xlu2 %v2727_v3, %s1793_s2 }
 0xc4d   :  { %v1234_v60 = vpop.permute.xlu2 %1233 }
 0xc4e   :  { %v1236_v59 = vadd.f32 %v1234_v60, %v1230_v34 }
 0xc50   :  { %1755 = vtanh.f32 %v1236_v59 }
 0xc55   :  { %v789_v33 = vpop.permute.xlu2 %788 }
 0xc56   :  { %v1756_v47 = vpop.eup %1755  ;;  %792 = vst.msk [vmem:[#allocation2] sm:$0x8] %vm791_vm13, %v789_v33 }
 0xc57   :  { %794 = vst.msk [vmem:[#allocation2 + $0x1] sm:$0x8] %vm793_vm14, %v789_v33  ;;  %v1238_v61 = vmul.f32 %v1756_v47, %v1223_v58 }
 0xc58   :  { %905 = vst.msk [vmem:[#allocation2] sm:$0x10] %vm904_vm15, %v902_v62 }
 0xc59   :  { %907 = vst.msk [vmem:[#allocation2 - $0x1] sm:$0x10] %vm906_vm0, %v902_v62  ;;  %1240 = vrot.lane.b32.xlu0 %v1238_v61, %s1793_s2 }
 0xc5d   :  { %v1128_v56 = vpop.permute.xlu2 %1127 }
 0xc5e   :  { %1131 = vst.msk [vmem:[#allocation2] sm:$0x40] %vm1130_vm1, %v1128_v56 }
 0xc5f   :  { %1133 = vst.msk [vmem:[#allocation2 - $0x5] sm:$0x40] %vm1132_vm2, %v1128_v56 }
 0xccb   :  { %v1241_v3 = vpop.permute.xlu0 %1240 }
 0xccc   :  { %1244 = vst.msk [vmem:[#allocation2] sm:$0x80] %vm1243_vm3, %v1241_v3 }
 0xccd   :  { %1246 = vst.msk [vmem:[#allocation2 - $0x7] sm:$0x80] %vm1245_vm4, %v1241_v3 }
 0xcd4   :  { %v2749_v46 = vld [vmem:[#allocation2] sm:$0xff] }
 0xcd5   :  { %v1252_v40 = vmul.f32 %v1676_v20, %v2749_v46 }
 0xcd7   :  { %v1253_v63 = vsel %vm356_vm8, %v1252_v40, 0.0 }
 0xcd8   :  { %1254 = vadd.xlane.f32.xlu1 %v1253_v63 }
 0xd4b   :  { %v1255_v42 = vpop.xlane.xlu1 %1254 }
 0xd4c   :  { %v1256_v49 = vrot.slane %v1255_v42, 4 }
 0xd4e   :  { %v1257_v17 = vmax.f32 %v1255_v42, %v1256_v49 }
 0xd50   :  { %v1258_v16 = vrot.slane %v1257_v17, 2 }
 0xd52   :  { %v1259_v2 = vmax.f32 %v1257_v17, %v1258_v16 }
 0xd54   :  { %v1260_v19 = vrot.slane %v1259_v2, 1 }
 0xd56   :  { %v1261_v41 = vmax.f32 %v1259_v2, %v1260_v19 }
 0xd58   :  { %v1262_v0 = vsub.f32 %v1255_v42, %v1261_v41 }
 0xd5a   :  { %v1263_v1 = vmul.f32 1.442695, %v1262_v0 }
 0xd5c   :  { %1757 = vpow2.f32 %v1263_v1 }
 0xd62   :  { %v1758_v18 = vpop.eup %1757 }
 0xd63   :  { %v1265_v44 = vrot.slane %v1758_v18, 4 }
 0xd65   :  { %v1266_v39 = vadd.f32 %v1758_v18, %v1265_v44 }
 0xd67   :  { %v1267_v45 = vrot.slane %v1266_v39, 2 }
 0xd69   :  { %v1268_v53 = vadd.f32 %v1267_v45, %v1266_v39 }
 0xd6b   :  { %v1269_v43 = vrot.slane %v1268_v53, 1 }
 0xd6d   :  { %v1270_v57 = vadd.f32 %v1269_v43, %v1268_v53 }
 0xd6f   :  { %1759 = vrcp.f32 %v1270_v57  ;;  %v1282_v36 = vand.u32 2147483648, %v1270_v57  ;;  %v1280_v55 = vand.u32 2147483647, %v1270_v57  ;;  %vm1276_vm6 = vweird.f32 %v1270_v57 }
 0xd71   :  { %v1283_v37 = vor.u32 1.1754944e-38, %v1282_v36  ;;  %vm1281_vm9 = vcmp.eq.f32.partialorder %v1280_v55, 8.507059e+37 }
 0xd75   :  { %v1760_v38 = vpop.eup %1759 }
 0xd76   :  { %v1272_v51 = vmul.f32 %v1760_v38, %v1270_v57  ;;  %vm1277_vm5 = vweird.f32 %v1760_v38 }
 0xd77   :  { %vm1278_vm7 = vmor %vm1276_vm6, %vm1277_vm5 }
 0xd78   :  { %v1273_v21 = vsub.f32 1.0, %v1272_v51 }
 0xd7a   :  { %v1274_v50 = vmul.f32 %v1760_v38, %v1273_v21 }
 0xd7c   :  { %v1275_v54 = vadd.f32 %v1760_v38, %v1274_v50 }
 0xd7e   :  { %v1279_v48 = vsel %vm1278_vm7, %v1760_v38, %v1275_v54 }
 0xd7f   :  { %v1284_v32 = vsel %vm1281_vm9, %v1283_v37, %v1279_v48 }
 0xd80   :  { %v1285_v58 = vmul.f32 %v1758_v18, %v1284_v32 }
 0xd82   :  { %v1286_v34 = vmul.f32 %v1285_v58, %v2749_v46 }
 0xd84   :  { %v1287_v52 = vsel %vm356_vm8, %v1286_v34, 0.0 }
 0xd85   :  { %v1288_v35 = vrot.slane %v1287_v52, 4 }
 0xd87   :  { %v1289_v4 = vadd.f32 %v1288_v35, %v1287_v52 }
 0xd89   :  { %v1290_v60 = vrot.slane %v1289_v4, 2 }
 0xd8b   :  { %v1291_v59 = vadd.f32 %v1290_v60, %v1289_v4 }
 0xd8d   :  { %v1292_v33 = vrot.slane %v1291_v59, 1 }
 0xd8f   :  { %v2755_v47 = vadd.f32 %v1292_v33, %v1291_v59 }
 0xd90   :  { %1786 = dma.done.wait [#allocation5], 11776 }
 0xd91   :  { %1787 = vsyncadd [#allocation5], 4294955520  ;;  %1466 = vmatpush.msrb.mxu2 %v1928_v15 }
 0xd92   :  { %1788 = dma.done.wait [#allocation5 + $0x1], 768 }
 0xd93   :  { %1789 = vsyncadd [#allocation5 + $0x1], 4294966528  ;;  %1486 = vmatpush.msrb.mxu3 %v2008_v31  ;;  %1467 = vmatpush.msrb.mxu2 %v1923_v14  ;;  %v1316_v15 = vld [vmem:[%s2920_s6 + $0x38] sm:$0xff]  ;;  %v1315_v31 = vld [vmem:[%s2920_s6 + $0x30] sm:$0xff]  ;;  %vm1462_vm10 = vcmask 785408   ;;  %s1794_s21 = smov [#allocation6]  }
 0xd94   :  { %v1308_v14 = vld [vmem:[%s2919_s5 + $0x38] sm:$0xff]  ;;  %1328 = vmatpush.msra.mxu0 %v1316_v15  ;;  %v3009_v56 = vld [vmem:[#allocation15_spill] sm:$0xff]  ;;  %v3010_v3 = vld [vmem:[#allocation21_spill] sm:$0xff]  ;;  %s1598_s22 = sshll.u32 %s1794_s21, 4  ;;  %s1600_s8 = sshll.u32 %s2924_s10, 4  ;;  %s1599_s22 = int_to_ptr.vmem [resolvable:$true] %s1598_s22  ;;  %s1601_s8 = int_to_ptr.hbm [resolvable:$true] %s1600_s8 }
 0xd95   :  { %1487 = vmatpush.msrb.mxu3 %v2003_v30  ;;  %1468 = vmatpush.msrb.mxu2 %v1918_v13  ;;  %v1314_v13 = vld [vmem:[%s2920_s6 + $0x28] sm:$0xff]  ;;  %v3004_v30 = vld [vmem:[#allocation39_spill] sm:$0xff]  ;;  %v3006_v62 = vld [vmem:[#allocation22_spill] sm:$0xff] }
 0xd96   :  { %1352 = vmatpush.msra.mxu1 %v1308_v14  ;;  %1329 = vmatpush.msra.mxu0 %v1315_v31  ;;  %v3007_v61 = vld [vmem:[#allocation38_spill] sm:$0xff]  ;;  %v3011_v20 = vld [vmem:[#allocation37_spill] sm:$0xff]  ;;  %v3014_v42 = vld [vmem:[#allocation20_spill] sm:$0xff] }
 0xd97   :  { %1488 = vmatpush.msrb.mxu3 %v1998_v29  ;;  %1469 = vmatpush.msrb.mxu2 %v1913_v12  ;;  %v1307_v12 = vld [vmem:[%s2919_s5 + $0x30] sm:$0xff]  ;;  %v3012_v40 = vld [vmem:[#allocation54_spill] sm:$0xff]  ;;  %v3015_v49 = vld [vmem:[#allocation36_spill] sm:$0xff] }
 0xd98   :  { %1353 = vmatpush.msra.mxu1 %v1307_v12  ;;  %1330 = vmatpush.msra.mxu0 %v1314_v13  ;;  %v3003_v29 = vld [vmem:[#allocation17_spill] sm:$0xff]  ;;  %v3013_v63 = vld [vmem:[#allocation14_spill] sm:$0xff]  ;;  %v3018_v2 = vld [vmem:[#allocation19_spill] sm:$0xff] }
 0xd99   :  { %1489 = vmatpush.msrb.mxu3 %v1993_v28  ;;  %1470 = vmatpush.msrb.mxu2 %v1908_v11  ;;  %v1306_v28 = vld [vmem:[%s2919_s5 + $0x28] sm:$0xff]  ;;  %v1313_v11 = vld [vmem:[%s2920_s6 + $0x20] sm:$0xff]  ;;  %v3016_v17 = vld [vmem:[#allocation53_spill] sm:$0xff] }
 0xd9a   :  { %1354 = vmatpush.msra.mxu1 %v1306_v28  ;;  %1331 = vmatpush.msra.mxu0 %v1313_v11  ;;  %v3017_v16 = vld [vmem:[#allocation13_spill] sm:$0xff]  ;;  %v3019_v19 = vld [vmem:[#allocation71_spill] sm:$0xff]  ;;  %v3021_v0 = vld [vmem:[#allocation52_spill] sm:$0xff] }
 0xd9b   :  { %1490 = vmatpush.msrb.mxu3 %v1988_v27  ;;  %1471 = vmatpush.msrb.mxu2 %v1903_v10  ;;  %v1305_v27 = vld [vmem:[%s2919_s5 + $0x20] sm:$0xff]  ;;  %v1312_v10 = vld [vmem:[%s2920_s6 + $0x18] sm:$0xff]  ;;  %v3027_v53 = vld [vmem:[#allocation69_spill] sm:$0xff] }
 0xd9c   :  { %1355 = vmatpush.msra.mxu1 %v1305_v27  ;;  %1332 = vmatpush.msra.mxu0 %v1312_v10  ;;  %v3020_v41 = vld [vmem:[#allocation35_spill] sm:$0xff]  ;;  %v3022_v1 = vld [vmem:[#allocation18_spill] sm:$0xff]  ;;  %v3028_v43 = vld [vmem:[#allocation33_spill] sm:$0xff] }
 0xd9d   :  { %1491 = vmatpush.msrb.mxu3 %v1983_v26  ;;  %1472 = vmatpush.msrb.mxu2 %v1898_v9  ;;  %v1304_v26 = vld [vmem:[%s2919_s5 + $0x18] sm:$0xff]  ;;  %v1311_v9 = vld [vmem:[%s2920_s6 + $0x10] sm:$0xff]  ;;  %v3025_v39 = vld [vmem:[#allocation51_spill] sm:$0xff] }
 0xd9e   :  { %1356 = vmatpush.msra.mxu1 %v1304_v26  ;;  %1333 = vmatpush.msra.mxu0 %v1311_v9  ;;  %v3023_v18 = vld [vmem:[#allocation70_spill] sm:$0xff]  ;;  %v3026_v45 = vld [vmem:[#allocation83_spill] sm:$0xff]  ;;  %v3031_v51 = vld [vmem:[#allocation68_spill] sm:$0xff] }
 0xd9f   :  { %1492 = vmatpush.msrb.mxu3 %v1978_v25  ;;  %1473 = vmatpush.msrb.mxu2 %v1893_v8  ;;  %v1303_v25 = vld [vmem:[%s2919_s5 + $0x10] sm:$0xff]  ;;  %v1310_v8 = vld [vmem:[%s2920_s6 + $0x8] sm:$0xff]  ;;  %v3024_v44 = vld [vmem:[#allocation34_spill] sm:$0xff] }
 0xda0   :  { %1357 = vmatpush.msra.mxu1 %v1303_v25  ;;  %1334 = vmatpush.msra.mxu0 %v1310_v8  ;;  %v3029_v57 = vld [vmem:[#allocation50_spill] sm:$0xff]  ;;  %v3032_v21 = vld [vmem:[#allocation32_spill] sm:$0xff]  ;;  %v3033_v36 = vld [vmem:[#allocation49_spill] sm:$0xff] }
 0xda1   :  { %1493 = vmatpush.msrb.mxu3 %v1973_v24  ;;  %1474 = vmatpush.msrb.mxu2 %v1888_v7  ;;  %v1302_v24 = vld [vmem:[%s2919_s5 + $0x8] sm:$0xff]  ;;  %v1309_v7 = vld [vmem:[%s2920_s6] sm:$0xff]  ;;  %v3030_v38 = vld [vmem:[#allocation82_spill] sm:$0xff] }
 0xda2   :  { %1358 = vmatpush.msra.mxu1 %v1302_v24  ;;  %1335 = vmatpush.msra.mxu0 %v1309_v7  ;;  %v3034_v50 = vld [vmem:[#allocation81_spill] sm:$0xff]  ;;  %v3035_v55 = vld [vmem:[#allocation67_spill] sm:$0xff]  ;;  %v3037_v37 = vld [vmem:[#allocation48_spill] sm:$0xff] }
 0xda3   :  { %1494 = vmatpush.msrb.mxu3 %v1968_v23  ;;  %1475 = vmatpush.msrb.mxu2 %v1883_v6  ;;  %v1301_v23 = vld [vmem:[%s2919_s5] sm:$0xff]  ;;  %v3038_v48 = vld [vmem:[#allocation80_spill] sm:$0xff]  ;;  %v3039_v32 = vld [vmem:[#allocation66_spill] sm:$0xff] }
 0xda4   :  { %v3002_v6 = vld [vmem:[#allocation23_spill] sm:$0xff]  ;;  %1506 = vmatpush.msrb.mxu0 %v3004_v30  ;;  %1359 = vmatpush.msra.mxu1 %v1301_v23  ;;  %v3040_v58 = vld [vmem:[#allocation30_spill] sm:$0xff]  ;;  %v3043_v35 = vld [vmem:[#allocation65_spill] sm:$0xff] }
 0xda5   :  { %1495 = vmatpush.msrb.mxu3 %v1963_v22  ;;  %1476 = vmatpush.msrb.mxu2 %v1878_v5  ;;  %v3005_v22 = vld [vmem:[#allocation16_spill] sm:$0xff]  ;;  %v3008_v5 = vld [vmem:[#allocation55_spill] sm:$0xff]  ;;  %v3044_v4 = vld [vmem:[#allocation29_spill] sm:$0xff] }
 0xda6   :  { %1507 = vmatpush.msrb.mxu0 %v3007_v61  ;;  %1526 = vmatpush.msrb.mxu1 %v3008_v5  ;;  %v3036_v54 = vld [vmem:[#allocation31_spill] sm:$0xff]  ;;  %v3045_v60 = vld [vmem:[#allocation46_spill] sm:$0xff]  ;;  %v3047_v33 = vld [vmem:[#allocation64_spill] sm:$0xff] }
 0xda7   :  { %1496 = vmatpush.msrb.mxu3 %v3002_v6  ;;  %1477 = vmatpush.msrb.mxu2 %v3003_v29  ;;  %v3041_v34 = vld [vmem:[#allocation47_spill] sm:$0xff]  ;;  %v3046_v59 = vld [vmem:[#allocation78_spill] sm:$0xff]  ;;  %v3048_v15 = vld [vmem:[#allocation28_spill] sm:$0xff] }
 0xda8   :  { %1508 = vmatpush.msrb.mxu0 %v3011_v20  ;;  %1527 = vmatpush.msrb.mxu1 %v3012_v40  ;;  %v3042_v52 = vld [vmem:[#allocation79_spill] sm:$0xff]  ;;  %v3049_v31 = vld [vmem:[#allocation45_spill] sm:$0xff]  ;;  %v3052_v13 = vld [vmem:[#allocation84_spill] sm:$0xff] }
 0xda9   :  { %1478 = vmatpush.msrb.mxu2 %v3005_v22  ;;  %1497 = vmatpush.msrb.mxu3 %v3006_v62  ;;  %v3050_v14 = vld [vmem:[#allocation77_spill] sm:$0xff]  ;;  %v3051_v12 = vld [vmem:[#allocation63_spill] sm:$0xff]  ;;  %v3054_v11 = vld [vmem:[#allocation62_spill] sm:$0xff] }
 0xdaa   :  { %1509 = vmatpush.msrb.mxu0 %v3015_v49  ;;  %1528 = vmatpush.msrb.mxu1 %v3016_v17  ;;  %v3053_v28 = vld [vmem:[#allocation85_spill] sm:$0xff]  ;;  %v3055_v27 = vld [vmem:[#allocation27_spill] sm:$0xff]  ;;  %v3056_v10 = vld [vmem:[#allocation44_spill] sm:$0xff] }
 0xdab   :  { %1479 = vmatpush.msrb.mxu2 %v3009_v56  ;;  %1498 = vmatpush.msrb.mxu3 %v3010_v3  ;;  %v3057_v26 = vld [vmem:[#allocation76_spill] sm:$0xff]  ;;  %v3058_v9 = vld [vmem:[#allocation61_spill] sm:$0xff]  ;;  %v3059_v25 = vld [vmem:[#allocation26_spill] sm:$0xff] }
 0xdac   :  { %1510 = vmatpush.msrb.mxu0 %v3020_v41  ;;  %1529 = vmatpush.msrb.mxu1 %v3021_v0  ;;  %v3061_v8 = vld [vmem:[#allocation60_spill] sm:$0xff]  ;;  %v3062_v24 = vld [vmem:[#allocation75_spill] sm:$0xff]  ;;  %v3063_v7 = vld [vmem:[#allocation25_spill] sm:$0xff] }
 0xdad   :  { %1480 = vmatpush.msrb.mxu2 %v3013_v63  ;;  %1499 = vmatpush.msrb.mxu3 %v3014_v42  ;;  %v3064_v23 = vld [vmem:[#allocation42_spill] sm:$0xff]  ;;  %v3065_v6 = vld [vmem:[#allocation59_spill] sm:$0xff]  ;;  %v3067_v30 = vld [vmem:[#allocation24_spill] sm:$0xff] }
 0xdae   :  { %1511 = vmatpush.msrb.mxu0 %v3024_v44  ;;  %1530 = vmatpush.msrb.mxu1 %v3025_v39  ;;  %v3066_v29 = vld [vmem:[#allocation74_spill] sm:$0xff]  ;;  %v3068_v22 = vld [vmem:[#allocation41_spill] sm:$0xff]  ;;  %v3072_v5 = vld [vmem:[#allocation40_spill] sm:$0xff] }
 0xdaf   :  { %1481 = vmatpush.msrb.mxu2 %v3017_v16  ;;  %1500 = vmatpush.msrb.mxu3 %v3018_v2  ;;  %v3070_v62 = vld [vmem:[#allocation73_spill] sm:$0xff]  ;;  %v3071_v61 = vld [vmem:[#allocation86_spill] sm:$0xff]  ;;  %v3074_v3 = vld [vmem:[#allocation72_spill] sm:$0xff] }
 0xdb0   :  { %1512 = vmatpush.msrb.mxu0 %v3028_v43  ;;  %1531 = vmatpush.msrb.mxu1 %v3029_v57  ;;  %v3073_v56 = vld [vmem:[#allocation57_spill] sm:$0xff]  ;;  %v3075_v20 = vld [vmem:[#allocation87_spill] sm:$0xff]  ;;  %v3077_v63 = vld [vmem:[#allocation56_spill] sm:$0xff] }
 0xdb1   :  { %1546 = vmatpush.msra.mxu2 %v3019_v19  ;;  %1501 = vmatpush.msrb.mxu3 %v3022_v1  ;;  %v3076_v40 = vld [vmem:[#allocation89_spill] sm:$0xff]  ;;  %v3078_v42 = vld [vmem:[#allocation88_spill] sm:$0xff] }
 0xdb2   :  { %1513 = vmatpush.msrb.mxu0 %v3032_v21  ;;  %1532 = vmatpush.msrb.mxu1 %v3033_v36 }
 0xdb3   :  { %1547 = vmatpush.msra.mxu2 %v3023_v18  ;;  %1570 = vmatpush.msra.mxu3 %v3026_v45 }
 0xdb4   :  { %1514 = vmatpush.msrb.mxu0 %v3036_v54  ;;  %1533 = vmatpush.msrb.mxu1 %v3037_v37 }
 0xdb5   :  { %1548 = vmatpush.msra.mxu2 %v3027_v53  ;;  %1571 = vmatpush.msra.mxu3 %v3030_v38  ;;  %v1761_v38 = vld [vmem:[%s2921_s7] ss:$0 sm:$0xff] }
 0xdb6   :  { %1515 = vmatpush.msrb.mxu0 %v3040_v58  ;;  %1534 = vmatpush.msrb.mxu1 %v3041_v34 }
 0xdb7   :  { %1549 = vmatpush.msra.mxu2 %v3031_v51  ;;  %1572 = vmatpush.msra.mxu3 %v3034_v50 }
 0xdb8   :  { %1516 = vmatpush.msrb.mxu0 %v3044_v4  ;;  %1535 = vmatpush.msrb.mxu1 %v3045_v60 }
 0xdb9   :  { %1550 = vmatpush.msra.mxu2 %v3035_v55  ;;  %1573 = vmatpush.msra.mxu3 %v3038_v48 }
 0xdba   :  { %1517 = vmatpush.msrb.mxu0 %v3048_v15  ;;  %1536 = vmatpush.msrb.mxu1 %v3049_v31 }
 0xdbb   :  { %1551 = vmatpush.msra.mxu2 %v3039_v32  ;;  %1574 = vmatpush.msra.mxu3 %v3042_v52 }
 0xdbc   :  { %1668 = vmatmul.msk.f32.vlgmr.msra.gmra.mxu0 %vm356_vm8, %v2755_v47  ;;  %1482 = vmatmul.f32.vlgmr.msrb.gmra.mxu2 %v3052_v13  ;;  %v3060_v47 = vld [vmem:[#allocation43_spill] sm:$0xff] }
 0xdbd   :  { %1552 = vmatpush.msra.mxu2 %v3043_v35  ;;  %1575 = vmatpush.msra.mxu3 %v3046_v59 }
 0xdbe   :  { %1502 = vmatmul.f32.vlgmr.msrb.gmra.mxu3 %v3053_v28  ;;  %1518 = vmatpush.msrb.mxu0 %v3055_v27 }
 0xdbf   :  { %1553 = vmatpush.msra.mxu2 %v3047_v33  ;;  %1576 = vmatpush.msra.mxu3 %v3050_v14 }
 0xdc0   :  { %1537 = vmatpush.msrb.mxu1 %v3056_v10  ;;  %1519 = vmatpush.msrb.mxu0 %v3059_v25 }
 0xdc1   :  { %1554 = vmatpush.msra.mxu2 %v3051_v12  ;;  %1577 = vmatpush.msra.mxu3 %v3057_v26 }
 0xdc2   :  { %1669 = vmatmul.msk.f32.vlgmr.msra.gmra.mxu1 %vm356_vm8, %v2749_v46  ;;  %1520 = vmatpush.msrb.mxu0 %v3063_v7  ;;  %v3069_v46 = vld [vmem:[#allocation58_spill] sm:$0xff] }
 0xdc3   :  { %1555 = vmatpush.msra.mxu2 %v3054_v11  ;;  %1538 = vmatpush.msrb.mxu1 %v3060_v47 }
 0xdc4   :  { %1578 = vmatpush.msra.mxu3 %v3062_v24  ;;  %1521 = vmatpush.msrb.mxu0 %v3067_v30 }
 0xdc5   :  { %1556 = vmatpush.msra.mxu2 %v3058_v9  ;;  %1539 = vmatpush.msrb.mxu1 %v3064_v23 }
 0xdc6   :  { %1579 = vmatpush.msra.mxu3 %v3066_v29  ;;  %1522 = vmatmul.f32.vlgmr.msrb.gmra.mxu0 %v3071_v61 }
 0xdc7   :  { %1557 = vmatpush.msra.mxu2 %v3061_v8  ;;  %1540 = vmatpush.msrb.mxu1 %v3068_v22 }
 0xdc8   :  { %1580 = vmatpush.msra.mxu3 %v3070_v62 }
 0xdc9   :  { %1558 = vmatpush.msra.mxu2 %v3065_v6  ;;  %1541 = vmatpush.msrb.mxu1 %v3072_v5 }
 0xdca   :  { %1581 = vmatpush.msra.mxu3 %v3074_v3  ;;  %1542 = vmatmul.f32.vlgmr.msrb.gmra.mxu1 %v3075_v20 }
 0xdcb   :  { %1559 = vmatpush.msra.mxu2 %v3069_v46  ;;  %1670 = vmatmul.msk.f32.vlgmr.msra.gmra.mxu3 %vm1462_vm10, %v3076_v40 }
 0xdcd   :  { %1560 = vmatpush.msra.mxu2 %v3073_v56 }
 0xdcf   :  { %1561 = vmatpush.msra.mxu2 %v3077_v63 }
 0xdd0   :  { %1562 = vmatmul.f32.vlgmr.msra.gmra.mxu2 %v3078_v42 }
 0xe39   :  { %v1337_v49 = vpop.f32.mrf.mxu0 }
 0xe3a   :  { %v1340_v18 = vperm.slane %v1337_v49, 0 }
 0xe3f   :  { %v1361_v17 = vpop.f32.mrf.mxu1  ;;  %v1483_v16 = vpop.f32.mrf.mxu2 }
 0xe40   :  { %v1362_v43 = vadd.f32 %v1361_v17, %v1340_v18 }
 0xe41   :  { %v1503_v2 = vpop.f32.mrf.mxu3 }
 0xe42   :  { %v1504_v19 = vadd.f32 %v1503_v2, %v1483_v16 }
 0xe43   :  { %v1523_v41 = vpop.f32.mrf.mxu0 }
 0xe44   :  { %v1524_v0 = vadd.f32 %v1523_v41, %v1504_v19 }
 0xe47   :  { %v1543_v1 = vpop.f32.mrf.mxu1 }
 0xe48   :  { %v1544_v44 = vadd.f32 %v1543_v1, %v1524_v0 }
 0xe4e   :  { %v1583_v45 = vpop.f32.mrf.mxu3 }
 0xe53   :  { %v1563_v39 = vpop.f32.mrf.mxu2 }
 0xe54   :  { %v1564_v53 = vadd.f32 %v1563_v39, %v1544_v44 }
 0xe56   :  { %v1584_v57 = vadd.f32 %v1583_v45, %v1564_v53 }
 0xe58   :  { %v1586_v51 = vadd.f32 %v1584_v57, %v1362_v43 }
 0xe5a   :  { %v1591_v21 = vadd.f32 %v1761_v38, %v1586_v51 }
 0xe5c   :  { %1592 = vst.msk [vmem:[#allocation6] sm:$0xff] %vm356_vm8, %v1591_v21 }
 0xe5d   :  { %1603 = dma.vmem_to_hbm [thread:$0]  %s1599_s22, 128, %s1601_s8, [#allocation7]  }
 0xe5e   :  { %1790 = dma.done.wait [#allocation7], 128  }
 0xe5f   :  { %1791 = vsyncadd [#allocation7], 4294967168 }
 0xe60   :  { %1608 = vsyncpa [#allocation7], 1 }
 0xe61   :  { %1609 = vsyncmov [#allocation5] }
 0xe64   :  { %s1610_s25 = vpop.sfrf %1609 }
 0xe65   :  { %p1671_p0 = scmp.ne.s32.totalorder %s1610_s25, 0 }
 0xe67   :  { %1614 = shalt.err (%p1671_p0)  }
 0xe68   :  { %1616 = vsyncmov [#allocation5 + $0x1] }
 0xe6b   :  { %s1617_s7 = vpop.sfrf %1616 }
 0xe6c   :  { %p1672_p1 = scmp.ne.s32.totalorder %s1617_s7, 0 }
 0xe6e   :  { %1621 = shalt.err (%p1672_p1)  }

</bundles_post_ra>
